<compile_context>
chip_gen: v7x
topology: tpu7x:2x2x1
jax: 0.10.0
libtpu: 0.0.40
codegen_flags: <defaults>
</compile_context>

<pallas_src>
import jax
import jax.numpy as jnp
from jax.experimental import pallas as pl
from jax.experimental.pallas import tpu as pltpu

NUM_CLASSES = 20            # 15 "value" logits + 5 "color" logits
N_VALUES = 15
BOX_DIM = 4 * NUM_CLASSES   # bbox_pred output width (num_classes * 4) = 80
SLAB = 128                  # lane-dense fused output width (20 cls + 80 box + 28 pad)
BOX_LO = NUM_CLASSES + 4    # class-1 box columns 4:8 live in slab lanes 24:28
BOX_HI = NUM_CLASSES + 8
BETA = 1.0 / 9.0


def fasterrcnn_head_fused(x, w_cls, b_cls, w_box, b_box,
                          value_targets, color_targets, pos_mask, reg_targets,
                          *, tm=128):
    """Fused FastRCNNPredictor + fastrcnn_loss + pred_scores.

    x:           (N, C) f32 RoI box-head features
    w_cls/b_cls: (C, 20) / (1, 20)   cls_score Linear (already [in, out])
    w_box/b_box: (C, 80) / (1, 80)   bbox_pred Linear
    value_targets / color_targets: (N, 1) int32   = labels // 10, labels % 10
    pos_mask:    (N, 1) f32  = (labels > 0)
    reg_targets: (N, 4) f32
    Returns: class_logits (N,20), box_regression (N,80), pred_scores (N,20),
             cls_loss scalar, box_loss scalar.
    """
    N, C = x.shape
    tm = min(tm, N)
    assert N % tm == 0 and tm % 16 == 0, "row tile must divide N and be a multiple of 16 (bf16)"
    inv_n = 1.0 / float(N)

    # ---- host-side prep: fuse + zero-pad params into one lane-dense 128-wide slab ----
    w_fused = jnp.zeros((C, SLAB), jnp.float32)
    w_fused = w_fused.at[:, :NUM_CLASSES].set(w_cls)
    w_fused = w_fused.at[:, NUM_CLASSES:NUM_CLASSES + BOX_DIM].set(w_box)
    b_fused = jnp.zeros((1, SLAB), jnp.float32)
    b_fused = b_fused.at[:, :NUM_CLASSES].set(b_cls.reshape(1, -1))
    b_fused = b_fused.at[:, NUM_CLASSES:NUM_CLASSES + BOX_DIM].set(b_box.reshape(1, -1))
    # regression targets pre-placed at the class-1 box lanes (24:28) of the slab so the
    # smooth-L1 term is a full-vreg elementwise op with a lane mask (no lane slicing).
    rt_pad = jnp.zeros((N, SLAB), jnp.float32).at[:, BOX_LO:BOX_HI].set(reg_targets)

    x_bf = x.astype(jnp.bfloat16)          # bf16 MXU operands, f32 accumulation
    w_bf = w_fused.astype(jnp.bfloat16)
    vt = value_targets.reshape(N, 1).astype(jnp.int32)
    ct = color_targets.reshape(N, 1).astype(jnp.int32)
    pos = pos_mask.reshape(N, 1).astype(jnp.float32)

    def kernel(x_ref, w_ref, b_ref, vt_ref, ct_ref, pos_ref, rt_ref,
               out_ref, scores_ref, cls_loss_ref, box_loss_ref):
        i = pl.program_id(0)

        @pl.when(i == 0)
        def _init():
            cls_loss_ref[0, 0] = jnp.float32(0.0)
            box_loss_ref[0, 0] = jnp.float32(0.0)

        # --- fused FastRCNNPredictor: one 128-wide MXU matmul, f32 accumulation ---
        y = jnp.dot(x_ref[...], w_ref[...],
                    preferred_element_type=jnp.float32) + b_ref[...]      # (tm, 128)
        out_ref[...] = y                                                  # unmasked vst

        rows = y.shape[0]
        lane = jax.lax.broadcasted_iota(jnp.int32, (rows, SLAB), 1)
        mask_v = lane < N_VALUES                                          # value segment
        mask_c = jnp.logical_and(lane >= N_VALUES, lane < NUM_CLASSES)    # color segment
        mask_l = lane < NUM_CLASSES

        # --- single-pass masked softmax / logsumexp over both segments ---
        m_v = jnp.max(jnp.where(mask_v, y, -jnp.inf), axis=-1, keepdims=True)
        m_c = jnp.max(jnp.where(mask_c, y, -jnp.inf), axis=-1, keepdims=True)
        shift = jnp.where(mask_v, m_v, m_c)
        e = jnp.exp(jnp.where(mask_l, y - shift, 0.0))                    # one EUP pass
        s_v = jnp.sum(jnp.where(mask_v, e, 0.0), axis=-1, keepdims=True)
        s_c = jnp.sum(jnp.where(mask_c, e, 0.0), axis=-1, keepdims=True)

        # postprocess_detections scores: cat(softmax(:,:15), softmax(:,15:20))
        denom = jnp.where(mask_v, s_v, s_c)
        scores_ref[...] = jnp.where(mask_l, e / denom, 0.0)               # unmasked vst

        # --- cross-entropy (mean over all N rows, accumulated across row tiles) ---
        lse_v = m_v + jnp.log(s_v)
        lse_c = m_c + jnp.log(s_c)
        vt_b = vt_ref[...]                                                # (tm, 1) i32
        ct_b = ct_ref[...]
        picked_v = jnp.sum(jnp.where(lane == vt_b, y, 0.0), axis=-1, keepdims=True)
        picked_c = jnp.sum(jnp.where(lane == (ct_b + N_VALUES), y, 0.0),
                           axis=-1, keepdims=True)
        row_ce = (lse_v - picked_v) + (lse_c - picked_c)                  # (tm, 1)
        cls_loss_ref[0, 0] += jnp.sum(row_ce) * inv_n

        # --- smooth-L1 box loss on class-1 box columns (slab lanes 24:28), positives only ---
        d = y - rt_ref[...]
        ad = jnp.abs(d)
        sl1 = jnp.where(ad < BETA, (0.5 / BETA) * d * d, ad - 0.5 * BETA)
        box_mask = jnp.logical_and(lane >= BOX_LO, lane < BOX_HI)
        contrib = jnp.where(box_mask, sl1, 0.0) * pos_ref[...]
        box_loss_ref[0, 0] += jnp.sum(contrib) * inv_n

    grid = (N // tm,)
    cost = pl.CostEstimate(
        flops=2 * N * C * SLAB,
        transcendentals=N * (SLAB + 2),
        bytes_accessed=(N * C * 2 + C * SLAB * 2 + SLAB * 4          # x, w, b
                        + N * 12 + N * SLAB * 4                       # vt/ct/pos, rt_pad
                        + 2 * N * SLAB * 4 + 8),                      # outputs
    )

    slab, scores_slab, cls_loss, box_loss = pl.pallas_call(
        kernel,
        grid=grid,
        in_specs=[
            pl.BlockSpec((tm, C), lambda i: (i, 0)),        # x (bf16), row-tiled
            pl.BlockSpec((C, SLAB), lambda i: (0, 0)),      # fused weights (resident)
            pl.BlockSpec((1, SLAB), lambda i: (0, 0)),      # fused bias
            pl.BlockSpec((tm, 1), lambda i: (i, 0)),        # value targets
            pl.BlockSpec((tm, 1), lambda i: (i, 0)),        # color targets
            pl.BlockSpec((tm, 1), lambda i: (i, 0)),        # positive mask
            pl.BlockSpec((tm, SLAB), lambda i: (i, 0)),     # padded regression targets
        ],
        out_specs=[
            pl.BlockSpec((tm, SLAB), lambda i: (i, 0)),     # logits+box slab (lane-dense)
            pl.BlockSpec((tm, SLAB), lambda i: (i, 0)),     # scores slab (lane-dense)
            pl.BlockSpec(memory_space=pltpu.MemorySpace.SMEM),   # cls loss scalar
            pl.BlockSpec(memory_space=pltpu.MemorySpace.SMEM),   # box loss scalar
        ],
        out_shape=[
            jax.ShapeDtypeStruct((N, SLAB), jnp.float32),
            jax.ShapeDtypeStruct((N, SLAB), jnp.float32),
            jax.ShapeDtypeStruct((1, 1), jnp.float32),
            jax.ShapeDtypeStruct((1, 1), jnp.float32),
        ],
        compiler_params=pltpu.CompilerParams(
            # loss scalars accumulate across row tiles -> sequential grid axis
            dimension_semantics=("arbitrary",),
        ),
        cost_estimate=cost,
    )(x_bf, w_bf, b_fused, vt, ct, pos, rt_pad)

    class_logits = slab[:, :NUM_CLASSES]
    box_regression = slab[:, NUM_CLASSES:NUM_CLASSES + BOX_DIM]
    scores = scores_slab[:, :NUM_CLASSES]
    return class_logits, box_regression, scores, cls_loss[0, 0], box_loss[0, 0]


# ---------------------------------------------------------------------------
# Driver
# ---------------------------------------------------------------------------
if __name__ == "__main__":
    key = jax.random.PRNGKey(0)
    k_x, k_wc, k_wb, k_bc, k_bb, k_v, k_c, k_t = jax.random.split(key, 8)

    N = 256            # RoI proposals (rows)
    IN_FEATURES = 128  # box-head feature width

    x = jax.random.normal(k_x, (N, IN_FEATURES), dtype=jnp.float32)
    # PyTorch Linear stores W as [out, in]; pre-transpose to [in, out] for the kernel.
    w_cls = (0.02 * jax.random.normal(k_wc, (NUM_CLASSES, IN_FEATURES))).T.astype(jnp.float32)
    b_cls = (0.01 * jax.random.normal(k_bc, (1, NUM_CLASSES))).astype(jnp.float32)
    w_box = (0.02 * jax.random.normal(k_wb, (BOX_DIM, IN_FEATURES))).T.astype(jnp.float32)
    b_box = (0.01 * jax.random.normal(k_bb, (1, BOX_DIM))).astype(jnp.float32)

    # Synthetic targets: labels = value*10 + color, or 0 for background.
    v = jax.random.randint(k_v, (N, 1), 0, 15, dtype=jnp.int32)   # 0 => background
    c = jax.random.randint(k_c, (N, 1), 1, 5, dtype=jnp.int32)
    labels = jnp.where(v == 0, 0, v * 10 + c).astype(jnp.int32)
    regression_targets = jax.random.normal(k_t, (N, 4), dtype=jnp.float32)

    # Precompute integer div/mod and positive mask outside the kernel (VPU-friendly).
    value_targets = labels // 10
    color_targets = labels % 10
    pos_mask = (labels > 0).astype(jnp.float32)

    class_logits, box_regression, scores, cls_loss, box_loss = fasterrcnn_head_fused(
        x, w_cls, b_cls, w_box, b_box,
        value_targets, color_targets, pos_mask, regression_targets, tm=128)

    jax.block_until_ready((class_logits, box_regression, scores, cls_loss, box_loss))

    # --- lightweight reference checks (pure JAX, same math) ------------------
    # matmul check against the same bf16-rounded operands
    xf = x.astype(jnp.bfloat16).astype(jnp.float32)
    ref_logits = jnp.dot(xf, w_cls.astype(jnp.bfloat16).astype(jnp.float32),
                         precision=jax.lax.Precision.HIGHEST) + b_cls
    ref_boxes = jnp.dot(xf, w_box.astype(jnp.bfloat16).astype(jnp.float32),
                        precision=jax.lax.Precision.HIGHEST) + b_box
    assert jnp.allclose(class_logits, ref_logits, atol=5e-3, rtol=5e-3)
    assert jnp.allclose(box_regression, ref_boxes, atol=5e-3, rtol=5e-3)

    def ref_ce(lg, tgt):
        return jnp.mean(jax.nn.logsumexp(lg, axis=-1)
                        - jnp.take_along_axis(lg, tgt, axis=-1)[:, 0])

    ref_cls_loss = (ref_ce(class_logits[:, :N_VALUES], value_targets)
                    + ref_ce(class_logits[:, N_VALUES:NUM_CLASSES], color_targets))
    d = box_regression[:, 4:8] - regression_targets
    sl1 = jnp.where(jnp.abs(d) < BETA, 0.5 * d * d / BETA, jnp.abs(d) - 0.5 * BETA)
    ref_box_loss = jnp.sum(sl1 * pos_mask) / N
    ref_scores = jnp.concatenate(
        [jax.nn.softmax(class_logits[:, :N_VALUES], -1),
         jax.nn.softmax(class_logits[:, N_VALUES:NUM_CLASSES], -1)], -1)

    assert jnp.allclose(cls_loss, ref_cls_loss, atol=1e-3, rtol=1e-3)
    assert jnp.allclose(box_loss, ref_box_loss, atol=1e-3, rtol=1e-3)
    assert jnp.allclose(scores, ref_scores, atol=1e-4, rtol=1e-4)

    print("KERNEL_OK")
</pallas_src>

<mosaic_0001>
module attributes {stable_mosaic.version = 11 : i64} {
  func.func @kernel(%arg0: i32, %arg1: memref<128x128xbf16, #tpu.memory_space<vmem>>, %arg2: memref<128x128xbf16, #tpu.memory_space<vmem>>, %arg3: memref<1x128xf32, #tpu.memory_space<vmem>>, %arg4: memref<128x1xi32, #tpu.memory_space<vmem>>, %arg5: memref<128x1xi32, #tpu.memory_space<vmem>>, %arg6: memref<128x1xf32, #tpu.memory_space<vmem>>, %arg7: memref<128x128xf32, #tpu.memory_space<vmem>>, %arg8: memref<128x128xf32, #tpu.memory_space<vmem>>, %arg9: memref<128x128xf32, #tpu.memory_space<vmem>>, %arg10: memref<1x1xf32, #tpu.memory_space<smem>>, %arg11: memref<1x1xf32, #tpu.memory_space<smem>>) attributes {dimension_semantics = [#tpu.dimension_semantics<arbitrary>], iteration_bounds = array<i64: 2>, scalar_prefetch = 0 : i64, scratch_operands = 0 : i64, tpu.core_type = #tpu.core_type<tc>, window_params = [{transform_indices = @transform_0, window_bounds = array<i64: 128, 128>}, {pipeline_mode = #tpu.pipeline_mode<synchronous>, transform_indices = @transform_1, window_bounds = array<i64: 128, 128>}, {pipeline_mode = #tpu.pipeline_mode<synchronous>, transform_indices = @transform_2, window_bounds = array<i64: 1, 128>}, {transform_indices = @transform_3, window_bounds = array<i64: 128, 1>}, {transform_indices = @transform_4, window_bounds = array<i64: 128, 1>}, {transform_indices = @transform_5, window_bounds = array<i64: 128, 1>}, {transform_indices = @transform_6, window_bounds = array<i64: 128, 128>}, {transform_indices = @transform_7, window_bounds = array<i64: 128, 128>}, {transform_indices = @transform_8, window_bounds = array<i64: 128, 128>}, {transform_indices = @transform_9, window_bounds = array<i64: 1, 1>}, {transform_indices = @transform_10, window_bounds = array<i64: 1, 1>}]} {
    %c0_i32 = arith.constant 0 : i32
    %0 = arith.cmpi eq, %arg0, %c0_i32 : i32
    %1 = arith.extui %0 : i1 to i32
    %c0_i32_0 = arith.constant 0 : i32
    %2 = arith.cmpi ne, %1, %c0_i32_0 : i32
    scf.if %2 {
      %cst_51 = arith.constant 0.000000e+00 : f32
      %c0_52 = arith.constant 0 : index
      %c0_53 = arith.constant 0 : index
      %114 = memref.load %arg10[%c0_52, %c0_53] : memref<1x1xf32, #tpu.memory_space<smem>>
      memref.store %cst_51, %arg10[%c0_52, %c0_53] : memref<1x1xf32, #tpu.memory_space<smem>>
      %cst_54 = arith.constant 0.000000e+00 : f32
      %c0_55 = arith.constant 0 : index
      %c0_56 = arith.constant 0 : index
      %115 = memref.load %arg11[%c0_55, %c0_56] : memref<1x1xf32, #tpu.memory_space<smem>>
      memref.store %cst_54, %arg11[%c0_55, %c0_56] : memref<1x1xf32, #tpu.memory_space<smem>>
    } else {
    }
    %c0 = arith.constant 0 : index
    %c0_1 = arith.constant 0 : index
    %3 = vector.load %arg1[%c0, %c0_1] : memref<128x128xbf16, #tpu.memory_space<vmem>>, vector<128x128xbf16>
    %c0_2 = arith.constant 0 : index
    %c0_3 = arith.constant 0 : index
    %4 = vector.load %arg2[%c0_2, %c0_3] : memref<128x128xbf16, #tpu.memory_space<vmem>>, vector<128x128xbf16>
    %cst = arith.constant dense<0.000000e+00> : vector<128x128xf32>
    %5 = tpu.matmul %3, %4, %cst {dimension_numbers = #tpu.dot_dimension_numbers<[1], [0], [0], [1], [0, 0, 1, 1], [], []>} : vector<128x128xbf16>, vector<128x128xbf16>, vector<128x128xf32> -> vector<128x128xf32>
    %c0_4 = arith.constant 0 : index
    %c0_5 = arith.constant 0 : index
    %6 = vector.load %arg3[%c0_4, %c0_5] : memref<1x128xf32, #tpu.memory_space<vmem>>, vector<1x128xf32>
    %7 = vector.broadcast %6 : vector<1x128xf32> to vector<128x128xf32>
    %8 = arith.addf %5, %7 : vector<128x128xf32>
    %c0_6 = arith.constant 0 : index
    %c0_7 = arith.constant 0 : index
    %9 = vector.load %arg8[%c0_6, %c0_7] : memref<128x128xf32, #tpu.memory_space<vmem>>, vector<128x128xf32>
    tpu.vector_store %arg8[%c0_6, %c0_7], %8 {strides = array<i32>} : memref<128x128xf32, #tpu.memory_space<vmem>>, vector<128x128xf32>,
    %10 = tpu.iota {dimensions = array<i32: 1>} : vector<128x128xi32>
    %c15_i32 = arith.constant 15 : i32
    %11 = vector.broadcast %c15_i32 : i32 to vector<128x128xi32>
    %12 = arith.cmpi slt, %10, %11 : vector<128x128xi32>
    %c15_i32_8 = arith.constant 15 : i32
    %13 = vector.broadcast %c15_i32_8 : i32 to vector<128x128xi32>
    %14 = arith.cmpi sge, %10, %13 : vector<128x128xi32>
    %c20_i32 = arith.constant 20 : i32
    %15 = vector.broadcast %c20_i32 : i32 to vector<128x128xi32>
    %16 = arith.cmpi slt, %10, %15 : vector<128x128xi32>
    %17 = arith.andi %14, %16 : vector<128x128xi1>
    %c20_i32_9 = arith.constant 20 : i32
    %18 = vector.broadcast %c20_i32_9 : i32 to vector<128x128xi32>
    %19 = arith.cmpi slt, %10, %18 : vector<128x128xi32>
    %cst_10 = arith.constant 0xFF800000 : f32
    %20 = vector.broadcast %cst_10 : f32 to vector<128x128xf32>
    %21 = arith.select %12, %8, %20 : vector<128x128xi1>, vector<128x128xf32>
    %cst_11 = arith.constant dense<0xFF800000> : vector<128xf32>
    %22 = vector.multi_reduction <maximumf>, %21, %cst_11 [1] : vector<128x128xf32> to vector<128xf32>
    %23 = vector.shape_cast %22 : vector<128xf32> to vector<128x1xf32>
    %cst_12 = arith.constant 0xFF800000 : f32
    %24 = vector.broadcast %cst_12 : f32 to vector<128x128xf32>
    %25 = arith.select %17, %8, %24 : vector<128x128xi1>, vector<128x128xf32>
    %cst_13 = arith.constant dense<0xFF800000> : vector<128xf32>
    %26 = vector.multi_reduction <maximumf>, %25, %cst_13 [1] : vector<128x128xf32> to vector<128xf32>
    %27 = vector.shape_cast %26 : vector<128xf32> to vector<128x1xf32>
    %28 = vector.shape_cast %23 : vector<128x1xf32> to vector<128x1xf32>
    %29 = vector.broadcast %28 : vector<128x1xf32> to vector<128x128xf32>
    %30 = vector.shape_cast %27 : vector<128x1xf32> to vector<128x1xf32>
    %31 = vector.broadcast %30 : vector<128x1xf32> to vector<128x128xf32>
    %32 = arith.select %12, %29, %31 : vector<128x128xi1>, vector<128x128xf32>
    %33 = arith.subf %8, %32 : vector<128x128xf32>
    %cst_14 = arith.constant 0.000000e+00 : f32
    %34 = vector.broadcast %cst_14 : f32 to vector<128x128xf32>
    %35 = arith.select %19, %33, %34 : vector<128x128xi1>, vector<128x128xf32>
    %36 = math.exp %35 : vector<128x128xf32>
    %cst_15 = arith.constant 0.000000e+00 : f32
    %37 = vector.broadcast %cst_15 : f32 to vector<128x128xf32>
    %38 = arith.select %12, %36, %37 : vector<128x128xi1>, vector<128x128xf32>
    %cst_16 = arith.constant dense<0.000000e+00> : vector<128xf32>
    %39 = vector.multi_reduction <add>, %38, %cst_16 [1] : vector<128x128xf32> to vector<128xf32>
    %40 = vector.shape_cast %39 : vector<128xf32> to vector<128x1xf32>
    %cst_17 = arith.constant 0.000000e+00 : f32
    %41 = vector.broadcast %cst_17 : f32 to vector<128x128xf32>
    %42 = arith.select %17, %36, %41 : vector<128x128xi1>, vector<128x128xf32>
    %cst_18 = arith.constant dense<0.000000e+00> : vector<128xf32>
    %43 = vector.multi_reduction <add>, %42, %cst_18 [1] : vector<128x128xf32> to vector<128xf32>
    %44 = vector.shape_cast %43 : vector<128xf32> to vector<128x1xf32>
    %45 = vector.shape_cast %40 : vector<128x1xf32> to vector<128x1xf32>
    %46 = vector.broadcast %45 : vector<128x1xf32> to vector<128x128xf32>
    %47 = vector.shape_cast %44 : vector<128x1xf32> to vector<128x1xf32>
    %48 = vector.broadcast %47 : vector<128x1xf32> to vector<128x128xf32>
    %49 = arith.select %12, %46, %48 : vector<128x128xi1>, vector<128x128xf32>
    %50 = arith.divf %36, %49 : vector<128x128xf32>
    %cst_19 = arith.constant 0.000000e+00 : f32
    %51 = vector.broadcast %cst_19 : f32 to vector<128x128xf32>
    %52 = arith.select %19, %50, %51 : vector<128x128xi1>, vector<128x128xf32>
    %c0_20 = arith.constant 0 : index
    %c0_21 = arith.constant 0 : index
    %53 = vector.load %arg9[%c0_20, %c0_21] : memref<128x128xf32, #tpu.memory_space<vmem>>, vector<128x128xf32>
    tpu.vector_store %arg9[%c0_20, %c0_21], %52 {strides = array<i32>} : memref<128x128xf32, #tpu.memory_space<vmem>>, vector<128x128xf32>,
    %54 = math.log %40 : vector<128x1xf32>
    %55 = arith.addf %23, %54 : vector<128x1xf32>
    %56 = math.log %44 : vector<128x1xf32>
    %57 = arith.addf %27, %56 : vector<128x1xf32>
    %c0_22 = arith.constant 0 : index
    %c0_23 = arith.constant 0 : index
    %58 = vector.load %arg4[%c0_22, %c0_23] : memref<128x1xi32, #tpu.memory_space<vmem>>, vector<128x1xi32>
    %c0_24 = arith.constant 0 : index
    %c0_25 = arith.constant 0 : index
    %59 = vector.load %arg5[%c0_24, %c0_25] : memref<128x1xi32, #tpu.memory_space<vmem>>, vector<128x1xi32>
    %60 = vector.broadcast %58 : vector<128x1xi32> to vector<128x128xi32>
    %61 = arith.cmpi eq, %10, %60 : vector<128x128xi32>
    %cst_26 = arith.constant 0.000000e+00 : f32
    %62 = vector.broadcast %cst_26 : f32 to vector<128x128xf32>
    %63 = arith.select %61, %8, %62 : vector<128x128xi1>, vector<128x128xf32>
    %cst_27 = arith.constant dense<0.000000e+00> : vector<128xf32>
    %64 = vector.multi_reduction <add>, %63, %cst_27 [1] : vector<128x128xf32> to vector<128xf32>
    %65 = vector.shape_cast %64 : vector<128xf32> to vector<128x1xf32>
    %c15_i32_28 = arith.constant 15 : i32
    %66 = vector.broadcast %c15_i32_28 : i32 to vector<128x1xi32>
    %67 = arith.addi %59, %66 : vector<128x1xi32>
    %68 = vector.broadcast %67 : vector<128x1xi32> to vector<128x128xi32>
    %69 = arith.cmpi eq, %10, %68 : vector<128x128xi32>
    %cst_29 = arith.constant 0.000000e+00 : f32
    %70 = vector.broadcast %cst_29 : f32 to vector<128x128xf32>
    %71 = arith.select %69, %8, %70 : vector<128x128xi1>, vector<128x128xf32>
    %cst_30 = arith.constant dense<0.000000e+00> : vector<128xf32>
    %72 = vector.multi_reduction <add>, %71, %cst_30 [1] : vector<128x128xf32> to vector<128xf32>
    %73 = vector.shape_cast %72 : vector<128xf32> to vector<128x1xf32>
    %74 = arith.subf %55, %65 : vector<128x1xf32>
    %75 = arith.subf %57, %73 : vector<128x1xf32>
    %76 = arith.addf %74, %75 : vector<128x1xf32>
    %c0_31 = arith.constant 0 : index
    %c0_32 = arith.constant 0 : index
    %77 = memref.load %arg10[%c0_31, %c0_32] : memref<1x1xf32, #tpu.memory_space<smem>>
    %78 = vector.shape_cast %76 : vector<128x1xf32> to vector<1x128x1xf32>
    %cst_33 = arith.constant dense<0.000000e+00> : vector<1xf32>
    %79 = vector.multi_reduction <add>, %78, %cst_33 [1, 2] : vector<1x128x1xf32> to vector<1xf32>
    %80 = vector.shape_cast %79 : vector<1xf32> to vector<1x1x1xf32>
    %81 = vector.extract %80[0, 0, 0] : f32 from vector<1x1x1xf32>
    %cst_34 = arith.constant 3.906250e-03 : f32
    %82 = arith.mulf %81, %cst_34 : f32
    %83 = arith.addf %77, %82 : f32
    %c0_35 = arith.constant 0 : index
    %c0_36 = arith.constant 0 : index
    %84 = memref.load %arg10[%c0_35, %c0_36] : memref<1x1xf32, #tpu.memory_space<smem>>
    memref.store %83, %arg10[%c0_35, %c0_36] : memref<1x1xf32, #tpu.memory_space<smem>>
    %c0_37 = arith.constant 0 : index
    %c0_38 = arith.constant 0 : index
    %85 = vector.load %arg7[%c0_37, %c0_38] : memref<128x128xf32, #tpu.memory_space<vmem>>, vector<128x128xf32>
    %86 = arith.subf %8, %85 : vector<128x128xf32>
    %87 = math.absf %86 : vector<128x128xf32>
    %cst_39 = arith.constant 0.111111112 : f32
    %88 = vector.broadcast %cst_39 : f32 to vector<128x128xf32>
    %89 = arith.cmpf olt, %87, %88 : vector<128x128xf32>
    %cst_40 = arith.constant 4.500000e+00 : f32
    %90 = vector.broadcast %cst_40 : f32 to vector<128x128xf32>
    %91 = arith.mulf %90, %86 : vector<128x128xf32>
    %92 = arith.mulf %91, %86 : vector<128x128xf32>
    %cst_41 = arith.constant 0.055555556 : f32
    %93 = vector.broadcast %cst_41 : f32 to vector<128x128xf32>
    %94 = arith.subf %87, %93 : vector<128x128xf32>
    %95 = arith.select %89, %92, %94 : vector<128x128xi1>, vector<128x128xf32>
    %c24_i32 = arith.constant 24 : i32
    %96 = vector.broadcast %c24_i32 : i32 to vector<128x128xi32>
    %97 = arith.cmpi sge, %10, %96 : vector<128x128xi32>
    %c28_i32 = arith.constant 28 : i32
    %98 = vector.broadcast %c28_i32 : i32 to vector<128x128xi32>
    %99 = arith.cmpi slt, %10, %98 : vector<128x128xi32>
    %100 = arith.andi %97, %99 : vector<128x128xi1>
    %cst_42 = arith.constant 0.000000e+00 : f32
    %101 = vector.broadcast %cst_42 : f32 to vector<128x128xf32>
    %102 = arith.select %100, %95, %101 : vector<128x128xi1>, vector<128x128xf32>
    %c0_43 = arith.constant 0 : index
    %c0_44 = arith.constant 0 : index
    %103 = vector.load %arg6[%c0_43, %c0_44] : memref<128x1xf32, #tpu.memory_space<vmem>>, vector<128x1xf32>
    %104 = vector.broadcast %103 : vector<128x1xf32> to vector<128x128xf32>
    %105 = arith.mulf %102, %104 : vector<128x128xf32>
    %c0_45 = arith.constant 0 : index
    %c0_46 = arith.constant 0 : index
    %106 = memref.load %arg11[%c0_45, %c0_46] : memref<1x1xf32, #tpu.memory_space<smem>>
    %107 = vector.shape_cast %105 : vector<128x128xf32> to vector<1x128x128xf32>
    %cst_47 = arith.constant dense<0.000000e+00> : vector<1xf32>
    %108 = vector.multi_reduction <add>, %107, %cst_47 [1, 2] : vector<1x128x128xf32> to vector<1xf32>
    %109 = vector.shape_cast %108 : vector<1xf32> to vector<1x1x1xf32>
    %110 = vector.extract %109[0, 0, 0] : f32 from vector<1x1x1xf32>
    %cst_48 = arith.constant 3.906250e-03 : f32
    %111 = arith.mulf %110, %cst_48 : f32
    %112 = arith.addf %106, %111 : f32
    %c0_49 = arith.constant 0 : index
    %c0_50 = arith.constant 0 : index
    %113 = memref.load %arg11[%c0_49, %c0_50] : memref<1x1xf32, #tpu.memory_space<smem>>
    memref.store %112, %arg11[%c0_49, %c0_50] : memref<1x1xf32, #tpu.memory_space<smem>>
    return
  }
  func.func @transform_0(%arg0: i32) -> (i32, i32) {
    %c0_i32 = arith.constant 0 : i32
    %c0_i32_0 = arith.constant 0 : i32
    return %arg0, %c0_i32 : i32, i32
  }
  func.func @transform_1(%arg0: i32) -> (i32, i32) {
    %c0_i32 = arith.constant 0 : i32
    %c0_i32_0 = arith.constant 0 : i32
    %c0_i32_1 = arith.constant 0 : i32
    return %c0_i32, %c0_i32_0 : i32, i32
  }
  func.func @transform_2(%arg0: i32) -> (i32, i32) {
    %c0_i32 = arith.constant 0 : i32
    %c0_i32_0 = arith.constant 0 : i32
    %c0_i32_1 = arith.constant 0 : i32
    return %c0_i32, %c0_i32_0 : i32, i32
  }
  func.func @transform_3(%arg0: i32) -> (i32, i32) {
    %c0_i32 = arith.constant 0 : i32
    %c0_i32_0 = arith.constant 0 : i32
    return %arg0, %c0_i32 : i32, i32
  }
  func.func @transform_4(%arg0: i32) -> (i32, i32) {
    %c0_i32 = arith.constant 0 : i32
    %c0_i32_0 = arith.constant 0 : i32
    return %arg0, %c0_i32 : i32, i32
  }
  func.func @transform_5(%arg0: i32) -> (i32, i32) {
    %c0_i32 = arith.constant 0 : i32
    %c0_i32_0 = arith.constant 0 : i32
    return %arg0, %c0_i32 : i32, i32
  }
  func.func @transform_6(%arg0: i32) -> (i32, i32) {
    %c0_i32 = arith.constant 0 : i32
    %c0_i32_0 = arith.constant 0 : i32
    return %arg0, %c0_i32 : i32, i32
  }
  func.func @transform_7(%arg0: i32) -> (i32, i32) {
    %c0_i32 = arith.constant 0 : i32
    %c0_i32_0 = arith.constant 0 : i32
    return %arg0, %c0_i32 : i32, i32
  }
  func.func @transform_8(%arg0: i32) -> (i32, i32) {
    %c0_i32 = arith.constant 0 : i32
    %c0_i32_0 = arith.constant 0 : i32
    return %arg0, %c0_i32 : i32, i32
  }
  func.func @transform_9(%arg0: i32) -> (i32, i32) {
    %c0_i32 = arith.constant 0 : i32
    %c0_i32_0 = arith.constant 0 : i32
    %c0_i32_1 = arith.constant 0 : i32
    return %c0_i32, %c0_i32_0 : i32, i32
  }
  func.func @transform_10(%arg0: i32) -> (i32, i32) {
    %c0_i32 = arith.constant 0 : i32
    %c0_i32_0 = arith.constant 0 : i32
    %c0_i32_1 = arith.constant 0 : i32
    return %c0_i32, %c0_i32_0 : i32, i32
  }
}

</mosaic_0001>

<bundles_post_ra>
// kernel: tpu_custom_call.1
= control target key start
LH: loop header
LB: loop body
LE: loop exit
PB: predicated region body
PF: predicated region fallthrough
CT: control target
= control target key end

     0   :  { %s4094_s0 = inlined_call_operand.vmem [shape: bf16[256,128], index: 0, kind: input, shape index: {}]   ;;  %s4095_s1 = inlined_call_operand.vmem [shape: bf16[128,128], index: 1, kind: input, shape index: {}]   ;;  %s4096_s2 = inlined_call_operand.vmem [shape: f32[1,128], index: 2, kind: input, shape index: {}]   ;;  %s4097_s3 = inlined_call_operand.vmem [shape: s32[256,1], index: 3, kind: input, shape index: {}]   ;;  %s4098_s4 = inlined_call_operand.vmem [shape: s32[256,1], index: 4, kind: input, shape index: {}]   ;;  %s4099_s5 = inlined_call_operand.vmem [shape: f32[256,1], index: 5, kind: input, shape index: {}]   ;;  %s4100_s6 = inlined_call_operand.vmem [shape: f32[256,128], index: 6, kind: input, shape index: {}]   ;;  %s4101_s7 = inlined_call_operand.hbm [shape: f32[256,128], index: 7, kind: output, shape index: {0}]   ;;  %s4102_s8 = inlined_call_operand.hbm [shape: f32[256,128], index: 8, kind: output, shape index: {1}]   ;;  %s4103_s9 = inlined_call_operand.hbm [shape: f32[1,1], index: 9, kind: output, shape index: {2}]   ;;  %s4104_s10 = inlined_call_operand.hbm [shape: f32[1,1], index: 10, kind: output, shape index: {3}]  }
   0x1   :  { %4125 = sst [smem:[#allocation42_spill]] %s4094_s0 }
   0x2   :  { %4126 = sst [smem:[#allocation43_spill]] %s4095_s1 }
   0x3   :  { %4127 = sst [smem:[#allocation44_spill]] %s4096_s2 }
   0x4   :  { %16 = vsyncpa [#allocation3], 0 }
   0x5   :  { %18 = vsyncpa [#allocation3 + $0x1], 0 }
   0x6   :  { %19 = vsyncpa [#allocation6], 0 }
   0x7   :  { %21 = vsyncpa [#allocation6 + $0x1], 0 }
   0x8   :  { %22 = vsyncpa [#allocation4], 0 }
   0x9   :  { %23 = vsyncpa [#allocation9], 0  ;;  %s2593_s13 = smov 0   ;;  %s2595_s14 = smov 0  }
   0xa   :  { %s2597_s15 = smov 0   ;;  %s2599_s16 = smov 0  }
   0xb LB: > { %s2614_s17 = sadd.s32 4294967295, %s2528_s16   ;;  %s2042_s18 = sadd.s32 4294967294, %s2528_s16   ;;  %s2528_s16 = sphi %s2599_s16, %s4232_s16   ;;  %s2524_s15 = sphi %s2597_s15, %s4231_s15   ;;  %s2520_s14 = sphi %s2595_s14, %s4230_s14   ;;  %s2516_s13 = sphi %s2593_s13, %s4229_s13  }
   0xc   : > { %s2618_s19 = sadd.s32 1, %s2528_s16   ;;  %s208_s20 = sadd.s32 1, %s2524_s15 }
   0xd   : > { %s205_s21 = ssub.s32 %s2528_s16, %s2618_s19  ;;  %p218_p0 = scmp.ne.s32.totalorder %s2524_s15, %s2520_s14 }
   0xe   : > { %p206_p1 = scmp.eq.s32.totalorder %s205_s21, 0  ;;  %p219_p2 = scmp.eq.s32.totalorder %s2614_s17, 1 }
   0xf   : > { %p224_p3 = scmp.ne.s32.totalorder %s2520_s14, %s2516_s13  ;;  %p225_p4 = scmp.eq.s32.totalorder %s2042_s18, 1 }
  0x10   : > { %s2629_s22 = scalar_select %p206_p1, %s2524_s15, %s208_s20  }
  0x11   : > { %p2633_p5 = por %p219_p2, %p218_p0  ;;  %p2637_p6 = por %p225_p4, %p224_p3 }
  0x12   : > { %4128 = sst [smem:[#allocation14_spill]] %s2629_s22  ;;  %p2045_p7 = scmp.ge.s32.totalorder %s2528_s16, 1 }
  0x13   : > { %p362_p8 = scmp.lt.s32.totalorder %s2528_s16, 3 }
  0x15   : > { %p363_p9 = pnand %p2045_p7, %p362_p8 }
  0x17   : > { %366 = sbr.rel (%p363_p9) target bundleno = 956 (0x3bc), region = 48 }
  0x1e   : > { %s4131_s1 = sld [smem:[#allocation43_spill]]  ;;  %s2048_s29 = sshll.u32 %s2614_s17, 4  ;;  %v2530_v3 = vmov 0  }
  0x1f   : > { %p426_p10 = scmp.lt.s32.totalorder %s2048_s29, 31  ;;  %2241 = vset.pattern.permute.xlu1 %v2530_v3  ;;  %2240 = vset.pattern.permute.xlu0 %v2530_v3  ;;  %s4132_s0 = sld [smem:[#allocation42_spill]] }
  0x20   : > { %s4133_s2 = sld [smem:[#allocation44_spill]]  ;;  %p2196_p11 = scmp.eq.s32.totalorder %s2614_s17, 0 }
  0x21   : > { %s4234_s29 = smov (!%p426_p10, %s2048_s29), 31  ;;  %s4124_s22 = sshll.u32 %s2614_s17, 11 }
  0x22   : > { %s2653_s12 = sshll.u32 %s4234_s29, 3  ;;  %s2049_s27 = sshll.u32 %s4234_s29, 2 }
  0x23   : > { %s2662_s26 = scalar_lea.vmem %s4097_s3, %s2653_s12  ;;  %s2688_s28 = scalar_lea.vmem %s4098_s4, %s2653_s12 }
  0x24   : > { %v2242_v0 = vld [vmem:[%s4131_s1] sm:$0xff]   ;;  %v2243_v1 = vld [vmem:[%s4131_s1 + $0x8] sm:$0xff]   ;;  %v2244_v2 = vld [vmem:[%s4131_s1 + $0x10] sm:$0xff]  }
  0x25   : > { %2122 = vmatprep.subr.bf16.mxu0 %v2242_v0  ;;  %2154 = vmatprep.subr.bf16.mxu1 %v2242_v0  ;;  %v2245_v4 = vld [vmem:[%s4131_s1 + $0x18] sm:$0xff]   ;;  %v1169_v5 = vld [vmem:[%s2662_s26 + $0x8] sm:$0xff]  ;;  %v2246_v6 = vld [vmem:[%s4131_s1 + $0x20] sm:$0xff]   ;;  %s2672_s18 = scalar_lea.vmem %s4132_s0, %s2049_s27  ;;  %s3396_s27 = scalar_lea.vmem %s4099_s5, %s2653_s12 }
  0x26   : > { %2123 = vmatpush3.bf16.msra.mxu0 %v2242_v0  ;;  %2162 = vmatpush3.bf16.msra.mxu1 %v2242_v0  ;;  %v1170_v7 = vld [vmem:[%s2662_s26 + $0x10] sm:$0xff]  ;;  %v2250_v8 = vld [vmem:[%s2672_s18] sm:$0xff]   ;;  %v1171_v10 = vld [vmem:[%s2662_s26 + $0x18] sm:$0xff] }
  0x27   : > { %2124 = vmatprep.subr.bf16.mxu0 %v2243_v1  ;;  %2155 = vmatprep.subr.bf16.mxu1 %v2243_v1  ;;  %v2251_v9 = vld [vmem:[%s2672_s18 + $0x20] sm:$0xff]   ;;  %v2247_v11 = vld [vmem:[%s4131_s1 + $0x28] sm:$0xff]   ;;  %v2248_v13 = vld [vmem:[%s4131_s1 + $0x30] sm:$0xff]  }
  0x28   : > { %1204 = vperm.xlu1 %2241, %v1169_v5   ;;  %2138 = vmatprep.mubr.bf16.mxu0 %v2250_v8  ;;  %v1172_v12 = vld [vmem:[%s2662_s26 + $0x20] sm:$0xff]  ;;  %v1186_v15 = vld [vmem:[%s2688_s28 + $0x10] sm:$0xff]  ;;  %v1173_v16 = vld [vmem:[%s2662_s26 + $0x28] sm:$0xff] }
  0x29   : > { %2146 = vmatprep.mubr.bf16.mxu1 %v2251_v9  ;;  %v1168_v14 = vld [vmem:[%s2662_s26] sm:$0xff]  ;;  %v1314_v17 = vadd.s32 15, %v1186_v15  ;;  %v2249_v19 = vld [vmem:[%s4131_s1 + $0x38] sm:$0xff]   ;;  %v1174_v21 = vld [vmem:[%s2662_s26 + $0x30] sm:$0xff] }
  0x2a   : > { %2125 = vmatpush3.bf16.msra.mxu0 %v2243_v1  ;;  %2163 = vmatpush3.bf16.msra.mxu1 %v2243_v1  ;;  %v1188_v18 = vld [vmem:[%s2688_s28 + $0x20] sm:$0xff]  ;;  %v1190_v23 = vld [vmem:[%s2688_s28 + $0x30] sm:$0xff]  ;;  %v2252_v24 = vld [vmem:[%s2672_s18 + $0x8] sm:$0xff]  }
  0x2b   : > { %2126 = vmatprep.subr.bf16.mxu0 %v2244_v2  ;;  %2156 = vmatprep.subr.bf16.mxu1 %v2244_v2  ;;  %v1316_v20 = vadd.s32 15, %v1188_v18  ;;  %v1184_v22 = vld [vmem:[%s2688_s28] sm:$0xff]  ;;  %v2253_v25 = vld [vmem:[%s2672_s18 + $0x28] sm:$0xff]   ;;  %v2254_v27 = vld [vmem:[%s2672_s18 + $0x10] sm:$0xff]   ;;  %v1318_v30 = vadd.s32 15, %v1190_v23 }
  0x2c   : > { %1207 = vperm.xlu1 %2241, %v1170_v7   ;;  %1201 = vperm.xlu0 %2240, %v1168_v14   ;;  %v1312_v26 = vadd.s32 15, %v1184_v22  ;;  %v2255_v28 = vld [vmem:[%s2672_s18 + $0x30] sm:$0xff]   ;;  %v1185_v29 = vld [vmem:[%s2688_s28 + $0x8] sm:$0xff]  ;;  %v1191_v31 = vld [vmem:[%s2688_s28 + $0x38] sm:$0xff] }
  0x2d   : > { %v1313_v32 = vadd.s32 15, %v1185_v29  ;;  %v1187_v33 = vld [vmem:[%s2688_s28 + $0x18] sm:$0xff]  ;;  %v1319_v34 = vadd.s32 15, %v1191_v31  ;;  %v1192_v35 = vld [vmem:[%s2688_s28 + $0x40] sm:$0xff]  ;;  %v1189_v39 = vld [vmem:[%s2688_s28 + $0x28] sm:$0xff] }
  0x2e   : > { %2127 = vmatpush3.bf16.msra.mxu0 %v2244_v2  ;;  %2164 = vmatpush3.bf16.msra.mxu1 %v2244_v2  ;;  %v2256_v36 = vld [vmem:[%s2672_s18 + $0x18] sm:$0xff]   ;;  %v1315_v38 = vadd.s32 15, %v1187_v33  ;;  %v1320_v40 = vadd.s32 15, %v1192_v35  ;;  %v1193_v41 = vld [vmem:[%s2688_s28 + $0x48] sm:$0xff]  ;;  %v1317_v42 = vadd.s32 15, %v1189_v39  ;;  %v1194_v44 = vld [vmem:[%s2688_s28 + $0x50] sm:$0xff] }
  0x2f   : > { %2128 = vmatprep.subr.bf16.mxu0 %v2245_v4  ;;  %2157 = vmatprep.subr.bf16.mxu1 %v2245_v4  ;;  %v2257_v37 = vld [vmem:[%s2672_s18 + $0x38] sm:$0xff]   ;;  %v1321_v43 = vadd.s32 15, %v1193_v41  ;;  %v1322_v46 = vadd.s32 15, %v1194_v44  ;;  %v1176_v48 = vld [vmem:[%s2662_s26 + $0x40] sm:$0xff]  ;;  %v1177_v51 = vld [vmem:[%s2662_s26 + $0x48] sm:$0xff] }
  0x30   : > { %1210 = vperm.xlu1 %2241, %v1171_v10   ;;  %1335 = vperm.xlu0 %2240, %v1314_v17   ;;  %v1175_v45 = vld [vmem:[%s2662_s26 + $0x38] sm:$0xff]  ;;  %v1196_v50 = vld [vmem:[%s2688_s28 + $0x60] sm:$0xff]  ;;  %v1197_v53 = vld [vmem:[%s2688_s28 + $0x68] sm:$0xff] }
  0x31   : > { %v1195_v47 = vld [vmem:[%s2688_s28 + $0x58] sm:$0xff]  ;;  %v1324_v52 = vadd.s32 15, %v1196_v50  ;;  %v1178_v54 = vld [vmem:[%s2662_s26 + $0x50] sm:$0xff]  ;;  %v1325_v55 = vadd.s32 15, %v1197_v53  ;;  %v1180_v60 = vld [vmem:[%s2662_s26 + $0x60] sm:$0xff] }
  0x32   : > { %2129 = vmatpush3.bf16.msra.mxu0 %v2245_v4  ;;  %2165 = vmatpush3.bf16.msra.mxu1 %v2245_v4  ;;  %v1323_v49 = vadd.s32 15, %v1195_v47  ;;  %v1198_v56 = vld [vmem:[%s2688_s28 + $0x70] sm:$0xff]  ;;  %v1179_v57 = vld [vmem:[%s2662_s26 + $0x58] sm:$0xff]  ;;  %v1181_v62 = vld [vmem:[%s2662_s26 + $0x68] sm:$0xff] }
  0x33   : > { %2130 = vmatprep.subr.bf16.mxu0 %v2246_v6  ;;  %2158 = vmatprep.subr.bf16.mxu1 %v2246_v6  ;;  %v1326_v58 = vadd.s32 15, %v1198_v56  ;;  %v1199_v59 = vld [vmem:[%s2688_s28 + $0x78] sm:$0xff]  ;;  %v1182_v63 = vld [vmem:[%s2662_s26 + $0x70] sm:$0xff]  ;;  %v2758_v15 = vld [vmem:[%s4133_s2] ss:$0 sm:$0xff] }
  0x34   : > { %1213 = vperm.xlu1 %2241, %v1172_v12   ;;  %1341 = vperm.xlu0 %2240, %v1316_v20   ;;  %v1327_v61 = vadd.s32 15, %v1199_v59  ;;  %v1183_v0 = vld [vmem:[%s2662_s26 + $0x78] sm:$0xff]  ;;  %s2750_s26 = sand.u32 1, %s2520_s14  }
  0x35   : > { %s2046_s18 = sshll.u32 %s2750_s26, 7 }
  0x36   : > { %2131 = vmatpush3.bf16.msra.mxu0 %v2246_v6  ;;  %2166 = vmatpush3.bf16.msra.mxu1 %v2246_v6  ;;  %s2781_s20 = scalar_lea.vmem [#allocation2], %s2046_s18  ;;  %s3443_s28 = scalar_lea.vmem [#allocation5], %s2046_s18 }
  0x37   : > { %2132 = vmatprep.subr.bf16.mxu0 %v2247_v11  ;;  %2159 = vmatprep.subr.bf16.mxu1 %v2247_v11  ;;  %s3510_s18 = scalar_lea.vmem %s4100_s6, %s2653_s12  ;;  %s2531_s12 = smov 0.0  }
  0x38   : > { %1216 = vperm.xlu1 %2241, %v1173_v16   ;;  %1347 = vperm.xlu0 %2240, %v1318_v30   ;;  %2175 = sst [smem:[#allocation7]] (%p2196_p11), %s2531_s12  ;;  %s1841_s29 = sshll.u32 %s2781_s20, 4  ;;  %s3971_s29 = int_to_ptr.vmem [resolvable:$true] %s1841_s29 }
  0x39   : > { %2176 = sst [smem:[#allocation8]] (%p2196_p11), %s2531_s12  ;;  %s2402_s11 = scalar_lea.vmem %s3971_s29, 2048 }
  0x3a   : > { %2133 = vmatpush3.bf16.msra.mxu0 %v2247_v11  ;;  %2167 = vmatpush3.bf16.msra.mxu1 %v2247_v11  ;;  %p2403_p12 = scmp.ne.s32.totalorder %s3971_s29, %s2402_s11 }
  0x3b   : > { %2134 = vmatprep.subr.bf16.mxu0 %v2248_v13  ;;  %2160 = vmatprep.subr.bf16.mxu1 %v2248_v13 }
  0x3c   : > { %1219 = vperm.xlu1 %2241, %v1174_v21   ;;  %1350 = vperm.xlu0 %2240, %v1319_v34   ;;  %p2404_p13 = pnand %p2403_p12, %p2633_p5 }
  0x3e   : > { %2135 = vmatpush3.bf16.msra.mxu0 %v2248_v13  ;;  %2168 = vmatpush3.bf16.msra.mxu1 %v2248_v13  ;;  %v714_v13 = vlaneseq  ;;  %p2405_p0 = pneg %p2404_p13 }
  0x3f   : > { %2136 = vmatprep.subr.bf16.mxu0 %v2249_v19  ;;  %2161 = vmatprep.subr.bf16.mxu1 %v2249_v19 }
  0x40   : > { %1329 = vperm.xlu1 %2241, %v1312_v26   ;;  %1353 = vperm.xlu0 %2240, %v1320_v40   ;;  %v2753_v14 = vand.u32 127, %v714_v13 }
  0x42   : > { %2137 = vmatpush3.bf16.msra.mxu0 %v2249_v19  ;;  %2169 = vmatpush3.bf16.msra.mxu1 %v2249_v19  ;;  %vm716_vm0 = vcmp.lt.s32.totalorder %v2753_v14, 15  ;;  %vm717_vm1 = vcmp.ge.s32.totalorder %v2753_v14, 15  ;;  %vm718_vm2 = vcmp.lt.s32.totalorder %v2753_v14, 20 }
  0x43   : > { %vm2813_vm3 = vmand %vm717_vm1, %vm718_vm2 }
  0x44   : > { %1332 = vperm.xlu1 %2241, %v1313_v32   ;;  %1356 = vperm.xlu0 %2240, %v1321_v43  }
  0x45   : > { %2139 = vmatmul.mubr.bf16.vlgmr.msra.gmra.mrb[0].mxu0 %v2252_v24  ;;  %2147 = vmatmul.mubr.bf16.vlgmr.msra.gmra.mrb[0].mxu1 %v2253_v25 }
  0x46   : > { %2142 = vmatprep.mubr.bf16.mxu0 %v2254_v27  ;;  %2150 = vmatprep.mubr.bf16.mxu1 %v2255_v28 }
  0x48   : > { %1338 = vperm.xlu1 %2241, %v1315_v38   ;;  %1359 = vperm.xlu0 %2240, %v1322_v46  }
  0x4c   : > { %1344 = vperm.xlu1 %2241, %v1317_v42   ;;  %1362 = vperm.xlu0 %2240, %v1323_v49  }
  0x4d   : > { %2143 = vmatmul.mubr.bf16.gmra.mrb[4].mxu0 %v2256_v36  ;;  %2151 = vmatmul.mubr.bf16.gmra.mrb[4].mxu1 %v2257_v37 }
  0x50   : > { %1222 = vperm.xlu1 %2241, %v1175_v45   ;;  %1365 = vperm.xlu0 %2240, %v1324_v52  }
  0x54   : > { %1225 = vperm.xlu1 %2241, %v1176_v48   ;;  %1368 = vperm.xlu0 %2240, %v1325_v55  }
  0x58   : > { %1228 = vperm.xlu1 %2241, %v1177_v51   ;;  %1371 = vperm.xlu0 %2240, %v1326_v58  }
  0x5c   : > { %1231 = vperm.xlu1 %2241, %v1178_v54   ;;  %1374 = vperm.xlu0 %2240, %v1327_v61  }
  0x60   : > { %1234 = vperm.xlu1 %2241, %v1179_v57  }
  0x64   : > { %1237 = vperm.xlu1 %2241, %v1180_v60  }
  0x68   : > { %1240 = vperm.xlu1 %2241, %v1181_v62  }
  0x6c   : > { %1243 = vperm.xlu1 %2241, %v1182_v63  }
  0x70   : > { %1246 = vperm.xlu1 %2241, %v1183_v0  }
  0xa7   : > { %v2727_v1 = vpop.permute.xlu1 %1204 }
  0xa8   : > { %vm1249_vm12 = vcmp.eq.s32.totalorder %v2753_v14, %v2727_v1 }
  0xab   : > { %v2729_v2 = vpop.permute.xlu1 %1207  ;;  %v2741_v8 = vpop.permute.xlu0 %1201 }
  0xac   : > { %vm1248_vm5 = vcmp.eq.s32.totalorder %v2753_v14, %v2741_v8  ;;  %vm1250_vm6 = vcmp.eq.s32.totalorder %v2753_v14, %v2729_v2 }
  0xaf   : > { %v2731_v3 = vpop.permute.xlu1 %1210  ;;  %v1336_v10 = vpop.permute.xlu0 %1335 }
  0xb0   : > { %vm1378_vm4 = vcmp.eq.s32.totalorder %v2753_v14, %v1336_v10  ;;  %vm1251_vm11 = vcmp.eq.s32.totalorder %v2753_v14, %v2731_v3 }
  0xb3   : > { %v2733_v4 = vpop.permute.xlu1 %1213  ;;  %v2747_v12 = vpop.permute.xlu0 %1341 }
  0xb4   : > { %vm1380_vm15 = vcmp.eq.s32.totalorder %v2753_v14, %v2747_v12 }
  0xb7   : > { %v2735_v5 = vpop.permute.xlu1 %1216  ;;  %v2762_v17 = vpop.permute.xlu0 %1347 }
  0xb8   : > { %vm1382_vm14 = vcmp.eq.s32.totalorder %v2753_v14, %v2762_v17 }
  0xbb   : > { %v2737_v6 = vpop.permute.xlu1 %1219  ;;  %v2828_v38 = vpop.permute.xlu0 %1350 }
  0xbc   : > { %vm1254_vm1 = vcmp.eq.s32.totalorder %v2753_v14, %v2737_v6 }
  0xbf   : > { %v2739_v7 = vpop.permute.xlu1 %1329  ;;  %v1354_v62 = vpop.permute.xlu0 %1353 }
  0xc0   : > { %vm1384_vm8 = vcmp.eq.s32.totalorder %v2753_v14, %v1354_v62  ;;  %vm1376_vm9 = vcmp.eq.s32.totalorder %v2753_v14, %v2739_v7 }
  0xc3   : > { %v2743_v9 = vpop.permute.xlu1 %1332 }
  0xc4   : > { %vm1377_vm13 = vcmp.eq.s32.totalorder %v2753_v14, %v2743_v9 }
  0xc7   : > { %v2745_v11 = vpop.permute.xlu1 %1338 }
  0xc8   : > { %vm1379_vm10 = vcmp.eq.s32.totalorder %v2753_v14, %v2745_v11 }
  0xcb   : > { %v2760_v16 = vpop.permute.xlu1 %1344 }
  0xcf   : > { %v2826_v37 = vpop.permute.xlu1 %1222 }
  0xd3   : > { %v1226_v59 = vpop.permute.xlu1 %1225 }
  0xd4   : > { %vm1256_vm7 = vcmp.eq.s32.totalorder %v2753_v14, %v1226_v59 }
 0x118   : > { %v2140_v18 = vpop.f32.mrb[0].mxu0  ;;  %v2148_v19 = vpop.f32.mrb[0].mxu1 }
 0x119   : > { %v2766_v20 = vadd.f32 %v2140_v18, %v2758_v15  ;;  %v2769_v21 = vadd.f32 %v2148_v19, %v2758_v15  ;;  %v635_v22 = vpop.f32.mrb[1].mxu0  ;;  %v667_v23 = vpop.f32.mrb[1].mxu1 }
 0x11a   : > { %v2774_v24 = vadd.f32 %v2758_v15, %v635_v22  ;;  %v2777_v25 = vadd.f32 %v2758_v15, %v667_v23  ;;  %v2141_v26 = vpop.f32.mrb[2].mxu0  ;;  %v2149_v27 = vpop.f32.mrb[2].mxu1 }
 0x11b   : > { %700 = vst [vmem:[%s2781_s20 + $0x10] sm:$0xff] %v2766_v20  ;;  %708 = vst [vmem:[%s2781_s20 + $0x50] sm:$0xff] %v2769_v21  ;;  %v2788_v28 = vadd.f32 %v2141_v26, %v2758_v15  ;;  %v2791_v29 = vadd.f32 %v2149_v27, %v2758_v15  ;;  %v638_v30 = vpop.f32.mrb[3].mxu0  ;;  %v670_v31 = vpop.f32.mrb[3].mxu1  ;;  %v730_v32 = vsel %vm716_vm0, %v2769_v21, -inf  ;;  %v722_v33 = vsel %vm716_vm0, %v2766_v20, -inf }
 0x11c   : > { %698 = vst [vmem:[%s2781_s20] sm:$0xff] %v2774_v24  ;;  %706 = vst [vmem:[%s2781_s20 + $0x40] sm:$0xff] %v2777_v25  ;;  %v2804_v34 = vadd.f32 %v2758_v15, %v638_v30  ;;  %v2807_v35 = vadd.f32 %v2758_v15, %v670_v31  ;;  %756 = vmax.xlane.f32.xlu0 %v730_v32  ;;  %740 = vmax.xlane.f32.xlu1 %v722_v33  ;;  %v770_v39 = vsel %vm2813_vm3, %v2766_v20, -inf }
 0x11d   : > { %701 = vst [vmem:[%s2781_s20 + $0x18] sm:$0xff] %v2788_v28  ;;  %709 = vst [vmem:[%s2781_s20 + $0x58] sm:$0xff] %v2791_v29  ;;  %v1394_v40 = vsel %vm1378_vm4, %v2766_v20, 0.0  ;;  %v778_v55 = vsel %vm2813_vm3, %v2769_v21, -inf  ;;  %v1264_v56 = vsel %vm1248_vm5, %v2774_v24, 0.0  ;;  %v1266_v60 = vsel %vm1250_vm6, %v2766_v20, 0.0 }
 0x11e   : > { %699 = vst [vmem:[%s2781_s20 + $0x8] sm:$0xff] %v2804_v34  ;;  %707 = vst [vmem:[%s2781_s20 + $0x48] sm:$0xff] %v2807_v35  ;;  %v1272_v61 = vsel %vm1256_vm7, %v2777_v25, 0.0  ;;  %v1400_v63 = vsel %vm1384_vm8, %v2777_v25, 0.0  ;;  %v720_v0 = vsel %vm716_vm0, %v2774_v24, -inf  ;;  %v723_v2 = vsel %vm716_vm0, %v2788_v28, -inf }
 0x11f   : > { %v728_v8 = vsel %vm716_vm0, %v2777_v25, -inf  ;;  %v731_v10 = vsel %vm716_vm0, %v2791_v29, -inf  ;;  %v768_v13 = vsel %vm2813_vm3, %v2774_v24, -inf  ;;  %v776_v18 = vsel %vm2813_vm3, %v2777_v25, -inf }
 0x120   : > { %v2152_v41 = vpop.f32.mrb[4].mxu1  ;;  %788 = vmax.xlane.f32.xlu0 %v770_v39  ;;  %1412 = vadd.xlane.f32.xlu1 %v1394_v40  ;;  %v2144_v42 = vpop.f32.mrb[4].mxu0  ;;  %v779_v19 = vsel %vm2813_vm3, %v2791_v29, -inf  ;;  %v1392_v22 = vsel %vm1376_vm9, %v2774_v24, 0.0  ;;  %v1395_v23 = vsel %vm1379_vm10, %v2788_v28, 0.0  ;;  %v1267_v26 = vsel %vm1251_vm11, %v2788_v28, 0.0 }
 0x121   : > { %v2835_v43 = vadd.f32 %v2152_v41, %v2758_v15  ;;  %v2838_v44 = vadd.f32 %v2144_v42, %v2758_v15  ;;  %v651_v45 = vpop.f32.mrb[5].mxu0  ;;  %v683_v46 = vpop.f32.mrb[5].mxu1  ;;  %v729_v7 = vsel %vm716_vm0, %v2807_v35, -inf  ;;  %v721_v27 = vsel %vm716_vm0, %v2804_v34, -inf }
 0x122   : > { %v2841_v47 = vadd.f32 %v2758_v15, %v651_v45  ;;  %v2844_v48 = vadd.f32 %v2758_v15, %v683_v46  ;;  %v2145_v49 = vpop.f32.mrb[6].mxu0  ;;  %v2153_v50 = vpop.f32.mrb[6].mxu1  ;;  %v769_v3 = vsel %vm2813_vm3, %v2804_v34, -inf  ;;  %v1265_v11 = vsel %vm1249_vm12, %v2804_v34, 0.0 }
 0x123   : > { %712 = vst [vmem:[%s2781_s20 + $0x70] sm:$0xff] %v2835_v43  ;;  %704 = vst [vmem:[%s2781_s20 + $0x30] sm:$0xff] %v2838_v44  ;;  %v2853_v51 = vadd.f32 %v2145_v49, %v2758_v15  ;;  %v2856_v52 = vadd.f32 %v2153_v50, %v2758_v15  ;;  %v654_v53 = vpop.f32.mrb[7].mxu0  ;;  %v686_v54 = vpop.f32.mrb[7].mxu1  ;;  %v726_v30 = vsel %vm716_vm0, %v2838_v44, -inf  ;;  %v777_v31 = vsel %vm2813_vm3, %v2807_v35, -inf }
 0x124   : > { %702 = vst [vmem:[%s2781_s20 + $0x20] sm:$0xff] %v2841_v47  ;;  %710 = vst [vmem:[%s2781_s20 + $0x60] sm:$0xff] %v2844_v48  ;;  %v2867_v57 = vadd.f32 %v2758_v15, %v654_v53  ;;  %v2870_v58 = vadd.f32 %v2758_v15, %v686_v54  ;;  %804 = vmax.xlane.f32.xlu0 %v778_v55  ;;  %1280 = vadd.xlane.f32.xlu1 %v1264_v56  ;;  %v771_v15 = vsel %vm2813_vm3, %v2788_v28, -inf  ;;  %v1357_v54 = vpop.permute.xlu0 %1356 }
 0x125   : > { %705 = vst [vmem:[%s2781_s20 + $0x38] sm:$0xff] %v2853_v51  ;;  %713 = vst [vmem:[%s2781_s20 + $0x78] sm:$0xff] %v2856_v52  ;;  %v734_v1 = vsel %vm716_vm0, %v2835_v43, -inf  ;;  %v1393_v32 = vsel %vm1377_vm13, %v2804_v34, 0.0  ;;  %v1398_v33 = vsel %vm1382_vm14, %v2838_v44, 0.0  ;;  %v774_v39 = vsel %vm2813_vm3, %v2838_v44, -inf }
 0x126   : > { %703 = vst [vmem:[%s2781_s20 + $0x28] sm:$0xff] %v2867_v57  ;;  %711 = vst [vmem:[%s2781_s20 + $0x68] sm:$0xff] %v2870_v58  ;;  %v1396_v9 = vsel %vm1380_vm15, %v2841_v47, 0.0  ;;  %v782_v40 = vsel %vm2813_vm3, %v2835_v43, -inf  ;;  %v727_v17 = vsel %vm716_vm0, %v2853_v51, -inf  ;;  %v1270_v41 = vsel %vm1254_vm1, %v2838_v44, 0.0 }
 0x127   : > { %v735_v12 = vsel %vm716_vm0, %v2856_v52, -inf  ;;  %v724_v42 = vsel %vm716_vm0, %v2841_v47, -inf  ;;  %v775_v6 = vsel %vm2813_vm3, %v2853_v51, -inf  ;;  %v732_v45 = vsel %vm716_vm0, %v2844_v48, -inf }
 0x128   : > { %1284 = vadd.xlane.f32.xlu0 %v1266_v60  ;;  %1296 = vadd.xlane.f32.xlu1 %v1272_v61  ;;  %v783_v46 = vsel %vm2813_vm3, %v2856_v52, -inf  ;;  %v772_v49 = vsel %vm2813_vm3, %v2841_v47, -inf  ;;  %vm1255_vm4 = vcmp.eq.s32.totalorder %v2753_v14, %v2826_v37  ;;  %v780_v53 = vsel %vm2813_vm3, %v2844_v48, -inf  ;;  %v1229_v37 = vpop.permute.xlu1 %1228 }
 0x129   : > { %v1271_v50 = vsel %vm1255_vm4, %v2853_v51, 0.0  ;;  %vm1252_vm5 = vcmp.eq.s32.totalorder %v2753_v14, %v2733_v4  ;;  %v725_v55 = vsel %vm716_vm0, %v2867_v57, -inf  ;;  %vm1383_vm6 = vcmp.eq.s32.totalorder %v2753_v14, %v2828_v38  ;;  %v1360_v4 = vpop.permute.xlu0 %1359 }
 0x12a   : > { %v1268_v56 = vsel %vm1252_vm5, %v2841_v47, 0.0  ;;  %v733_v59 = vsel %vm716_vm0, %v2870_v58, -inf  ;;  %v1399_v60 = vsel %vm1383_vm6, %v2853_v51, 0.0  ;;  %vm1253_vm7 = vcmp.eq.s32.totalorder %v2753_v14, %v2735_v5 }
 0x12b   : > { %v773_v62 = vsel %vm2813_vm3, %v2867_v57, -inf  ;;  %vm1257_vm8 = vcmp.eq.s32.totalorder %v2753_v14, %v1229_v37  ;;  %vm1381_vm9 = vcmp.eq.s32.totalorder %v2753_v14, %v2760_v16  ;;  %vm1385_vm11 = vcmp.eq.s32.totalorder %v2753_v14, %v1357_v54 }
 0x12c   : > { %1424 = vadd.xlane.f32.xlu1 %v1400_v63  ;;  %736 = vmax.xlane.f32.xlu0 %v720_v0  ;;  %v1232_v61 = vpop.permute.xlu1 %1231  ;;  %v1269_v63 = vsel %vm1253_vm7, %v2867_v57, 0.0  ;;  %v781_v0 = vsel %vm2813_vm3, %v2870_v58, -inf  ;;  %vm1386_vm14 = vcmp.eq.s32.totalorder %v2753_v14, %v1360_v4 }
 0x12d   : > { %v1363_v38 = vpop.permute.xlu0 %1362  ;;  %vm1258_vm13 = vcmp.eq.s32.totalorder %v2753_v14, %v1232_v61 }
 0x12e   : > { %v1274_v16 = vsel %vm1258_vm13, %v2769_v21, 0.0  ;;  %vm1387_vm15 = vcmp.eq.s32.totalorder %v2753_v14, %v1363_v38 }
 0x130   : > { %742 = vmax.xlane.f32.xlu1 %v723_v2  ;;  %752 = vmax.xlane.f32.xlu0 %v728_v8  ;;  %v1273_v2 = vsel %vm1257_vm8, %v2807_v35, 0.0  ;;  %v1235_v5 = vpop.permute.xlu1 %1234  ;;  %v1397_v8 = vsel %vm1381_vm9, %v2867_v57, 0.0 }
 0x131   : > { %vm1259_vm10 = vcmp.eq.s32.totalorder %v2753_v14, %v1235_v5 }
 0x134   : > { %758 = vmax.xlane.f32.xlu1 %v731_v10  ;;  %784 = vmax.xlane.f32.xlu0 %v768_v13  ;;  %v1275_v10 = vsel %vm1259_vm10, %v2791_v29, 0.0  ;;  %v1366_v13 = vpop.permute.xlu0 %1365  ;;  %vm1489_vm10 = vcmask 7168  }
 0x135   : > { %vm1388_vm12 = vcmp.eq.s32.totalorder %v2753_v14, %v1366_v13 }
 0x138   : > { %790 = vmax.xlane.f32.xlu1 %v771_v15  ;;  %800 = vmax.xlane.f32.xlu0 %v776_v18  ;;  %v1401_v15 = vsel %vm1385_vm11, %v2807_v35, 0.0  ;;  %v1404_v18 = vsel %vm1388_vm12, %v2844_v48, 0.0  ;;  %vm1663_vm11 = vcmp.lt.s32.totalorder %v2753_v14, 28 }
 0x13c   : > { %806 = vmax.xlane.f32.xlu1 %v779_v19  ;;  %1408 = vadd.xlane.f32.xlu0 %v1392_v22  ;;  %v1402_v19 = vsel %vm1386_vm14, %v2769_v21, 0.0  ;;  %v1403_v22 = vsel %vm1387_vm15, %v2791_v29, 0.0 }
 0x140   : > { %1414 = vadd.xlane.f32.xlu1 %v1395_v23  ;;  %1286 = vadd.xlane.f32.xlu0 %v1267_v26  ;;  %v1238_v23 = vpop.permute.xlu1 %1237 }
 0x141   : > { %vm1260_vm1 = vcmp.eq.s32.totalorder %v2753_v14, %v1238_v23 }
 0x142   : > { %v1276_v26 = vsel %vm1260_vm1, %v2844_v48, 0.0 }
 0x144   : > { %754 = vmax.xlane.f32.xlu1 %v729_v7  ;;  %738 = vmax.xlane.f32.xlu0 %v721_v27  ;;  %v3026_v7 = vpop.permute.xlu1 %1240  ;;  %v3028_v27 = vpop.permute.xlu0 %1368 }
 0x145   : > { %vm1389_vm4 = vcmp.eq.s32.totalorder %v2753_v14, %v3028_v27  ;;  %vm1261_vm7 = vcmp.eq.s32.totalorder %v2753_v14, %v3026_v7  ;;  %v1685_v7 = vld [vmem:[%s3396_s27 + $0x20] sm:$0xff] }
 0x148   : > { %786 = vmax.xlane.f32.xlu1 %v769_v3  ;;  %1282 = vadd.xlane.f32.xlu0 %v1265_v11  ;;  %v3030_v3 = vpop.permute.xlu1 %1243  ;;  %v3032_v11 = vpop.permute.xlu0 %1371 }
 0x149   : > { %vm1390_vm5 = vcmp.eq.s32.totalorder %v2753_v14, %v3032_v11  ;;  %vm1262_vm8 = vcmp.eq.s32.totalorder %v2753_v14, %v3030_v3 }
 0x14a   : > { %v1406_v27 = vsel %vm1390_vm5, %v2835_v43, 0.0 }
 0x14c   : > { %802 = vmax.xlane.f32.xlu1 %v777_v31  ;;  %748 = vmax.xlane.f32.xlu0 %v726_v30  ;;  %v3034_v30 = vpop.permute.xlu1 %1246  ;;  %v3036_v31 = vpop.permute.xlu0 %1374 }
 0x14d   : > { %vm1391_vm6 = vcmp.eq.s32.totalorder %v2753_v14, %v3036_v31  ;;  %vm1263_vm9 = vcmp.eq.s32.totalorder %v2753_v14, %v3034_v30  ;;  %v1682_v30 = vld [vmem:[%s3396_s27 + $0x8] sm:$0xff] }
 0x14e   : > { %v1279_v36 = vsel %vm1263_vm9, %v2856_v52, 0.0 }
 0x150   : > { %1410 = vadd.xlane.f32.xlu1 %v1393_v32  ;;  %764 = vmax.xlane.f32.xlu0 %v734_v1 }
 0x154   : > { %1420 = vadd.xlane.f32.xlu1 %v1398_v33  ;;  %796 = vmax.xlane.f32.xlu0 %v774_v39 }
 0x158   : > { %1416 = vadd.xlane.f32.xlu1 %v1396_v9  ;;  %812 = vmax.xlane.f32.xlu0 %v782_v40 }
 0x15c   : > { %750 = vmax.xlane.f32.xlu1 %v727_v17  ;;  %1292 = vadd.xlane.f32.xlu0 %v1270_v41 }
 0x160   : > { %766 = vmax.xlane.f32.xlu1 %v735_v12  ;;  %744 = vmax.xlane.f32.xlu0 %v724_v42 }
 0x164   : > { %798 = vmax.xlane.f32.xlu1 %v775_v6  ;;  %760 = vmax.xlane.f32.xlu0 %v732_v45 }
 0x168   : > { %814 = vmax.xlane.f32.xlu1 %v783_v46  ;;  %792 = vmax.xlane.f32.xlu0 %v772_v49 }
 0x16c   : > { %1294 = vadd.xlane.f32.xlu1 %v1271_v50  ;;  %808 = vmax.xlane.f32.xlu0 %v780_v53 }
 0x170   : > { %746 = vmax.xlane.f32.xlu1 %v725_v55  ;;  %1288 = vadd.xlane.f32.xlu0 %v1268_v56 }
 0x174   : > { %762 = vmax.xlane.f32.xlu1 %v733_v59  ;;  %1422 = vadd.xlane.f32.xlu0 %v1399_v60 }
 0x178   : > { %794 = vmax.xlane.f32.xlu1 %v773_v62  ;;  %1290 = vadd.xlane.f32.xlu0 %v1269_v63 }
 0x17c   : > { %810 = vmax.xlane.f32.xlu1 %v781_v0  ;;  %1298 = vadd.xlane.f32.xlu0 %v1273_v2 }
 0x180   : > { %1418 = vadd.xlane.f32.xlu1 %v1397_v8  ;;  %1302 = vadd.xlane.f32.xlu0 %v1275_v10 }
 0x184   : > { %1426 = vadd.xlane.f32.xlu1 %v1401_v15  ;;  %1432 = vadd.xlane.f32.xlu0 %v1404_v18 }
 0x188   : > { %1300 = vadd.xlane.f32.xlu1 %v1274_v16 }
 0x18c   : > { %1428 = vadd.xlane.f32.xlu1 %v1402_v19 }
 0x190   : > { %1430 = vadd.xlane.f32.xlu1 %v1403_v22 }
 0x194   : > { %1304 = vadd.xlane.f32.xlu1 %v1276_v26 }
 0x1a9   : > { %v3038_v1 = vpop.xlane.xlu0 %756  ;;  %v3040_v32 = vpop.xlane.xlu1 %740 }
 0x1ad   : > { %v3042_v33 = vpop.xlane.xlu0 %788  ;;  %v3044_v39 = vpop.xlane.xlu1 %1412 }
 0x1ae   : > { %v818_v9 = vsel %vm716_vm0, %v3040_v32, %v3042_v33 }
 0x1af   : > { %v834_v40 = vsub.f32 %v2766_v20, %v818_v9 }
 0x1b1   : > { %v850_v17 = vsel %vm718_vm2, %v834_v40, 0.0  ;;  %v3053_v41 = vpop.xlane.xlu0 %804  ;;  %v3055_v12 = vpop.xlane.xlu1 %1280 }
 0x1b2   : > { %v868_v42 = vmul.f32 1.442695, %v850_v17  ;;  %v826_v6 = vsel %vm716_vm0, %v3038_v1, %v3053_v41 }
 0x1b3   : > { %v842_v45 = vsub.f32 %v2769_v21, %v826_v6 }
 0x1b4   : > { %2258 = vpow2.f32 %v868_v42 }
 0x1b5   : > { %v858_v46 = vsel %vm718_vm2, %v842_v45, 0.0  ;;  %v3064_v20 = vpop.xlane.xlu0 %1284  ;;  %v3066_v49 = vpop.xlane.xlu1 %1296 }
 0x1b6   : > { %v884_v50 = vmul.f32 1.442695, %v858_v46 }
 0x1b8   : > { %2260 = vpow2.f32 %v884_v50 }
 0x1b9   : > { %v3068_v53 = vpop.xlane.xlu1 %1424  ;;  %v3070_v54 = vpop.xlane.xlu0 %736 }
 0x1bd   : > { %v3072_v55 = vpop.xlane.xlu1 %742  ;;  %v3074_v56 = vpop.xlane.xlu0 %752 }
 0x1be   : > { %v3076_v37 = vpop.eup %2258 }
 0x1bf   : > { %v898_v21 = vsel %vm716_vm0, %v3076_v37, 0.0  ;;  %v946_v15 = vsel %vm2813_vm3, %v3076_v37, 0.0 }
 0x1c0   : > { %916 = vadd.xlane.f32.xlu0 %v898_v21 }
 0x1c1   : > { %v3081_v59 = vpop.xlane.xlu1 %758  ;;  %v3083_v60 = vpop.xlane.xlu0 %784 }
 0x1c2   : > { %v3085_v4 = vpop.eup %2260  ;;  %v816_v61 = vsel %vm716_vm0, %v3070_v54, %v3083_v60 }
 0x1c3   : > { %v832_v62 = vsub.f32 %v2774_v24, %v816_v61  ;;  %v906_v63 = vsel %vm716_vm0, %v3085_v4, 0.0  ;;  %v954_v9 = vsel %vm2813_vm3, %v3085_v4, 0.0 }
 0x1c4   : > { %932 = vadd.xlane.f32.xlu0 %v906_v63 }
 0x1c5   : > { %v848_v38 = vsel %vm718_vm2, %v832_v62, 0.0  ;;  %v3097_v0 = vpop.xlane.xlu1 %790  ;;  %v3099_v2 = vpop.xlane.xlu0 %800 }
 0x1c6   : > { %v864_v5 = vmul.f32 1.442695, %v848_v38  ;;  %v819_v8 = vsel %vm716_vm0, %v3072_v55, %v3097_v0  ;;  %v824_v24 = vsel %vm716_vm0, %v3074_v56, %v3099_v2 }
 0x1c7   : > { %v835_v10 = vsub.f32 %v2788_v28, %v819_v8  ;;  %v840_v13 = vsub.f32 %v2777_v25, %v824_v24 }
 0x1c8   : > { %2262 = vpow2.f32 %v864_v5  ;;  %964 = vadd.xlane.f32.xlu0 %v946_v15 }
 0x1c9   : > { %v851_v18 = vsel %vm718_vm2, %v835_v10, 0.0  ;;  %v856_v16 = vsel %vm718_vm2, %v840_v13, 0.0  ;;  %v3118_v19 = vpop.xlane.xlu1 %806  ;;  %v3120_v22 = vpop.xlane.xlu0 %1408 }
 0x1ca   : > { %v870_v23 = vmul.f32 1.442695, %v851_v18  ;;  %v880_v28 = vmul.f32 1.442695, %v856_v16  ;;  %v827_v25 = vsel %vm716_vm0, %v3081_v59, %v3118_v19 }
 0x1cb   : > { %v843_v26 = vsub.f32 %v2791_v29, %v827_v25 }
 0x1cc   : > { %2264 = vpow2.f32 %v870_v23  ;;  %980 = vadd.xlane.f32.xlu0 %v954_v9 }
 0x1cd   : > { %2266 = vpow2.f32 %v880_v28  ;;  %v859_v40 = vsel %vm718_vm2, %v843_v26, 0.0  ;;  %v3132_v17 = vpop.xlane.xlu1 %1414  ;;  %v3134_v42 = vpop.xlane.xlu0 %1286 }
 0x1ce   : > { %v886_v6 = vmul.f32 1.442695, %v859_v40 }
 0x1d0   : > { %2268 = vpow2.f32 %v886_v6 }
 0x1d1   : > { %v3136_v45 = vpop.xlane.xlu1 %754  ;;  %v3138_v46 = vpop.xlane.xlu0 %738 }
 0x1d2   : > { %4136 = vst [vmem:[#allocation15_spill] sm:$0xff] %v3136_v45  ;;  %v3140_v29 = vpop.eup %2262 }
 0x1d3   : > { %v896_v50 = vsel %vm716_vm0, %v3140_v29, 0.0  ;;  %v944_v25 = vsel %vm2813_vm3, %v3140_v29, 0.0 }
 0x1d4   : > { %912 = vadd.xlane.f32.xlu0 %v896_v50 }
 0x1d5   : > { %v3145_v21 = vpop.xlane.xlu1 %786  ;;  %v3147_v61 = vpop.xlane.xlu0 %1282 }
 0x1d6   : > { %v3149_v62 = vpop.eup %2264  ;;  %v817_v63 = vsel %vm716_vm0, %v3138_v46, %v3145_v21 }
 0x1d7   : > { %v3155_v38 = vpop.eup %2266  ;;  %v833_v5 = vsub.f32 %v2804_v34, %v817_v63  ;;  %v899_v8 = vsel %vm716_vm0, %v3149_v62, 0.0 }
 0x1d8   : > { %918 = vadd.xlane.f32.xlu1 %v899_v8  ;;  %v904_v24 = vsel %vm716_vm0, %v3155_v38, 0.0  ;;  %v952_v50 = vsel %vm2813_vm3, %v3155_v38, 0.0 }
 0x1d9   : > { %v849_v10 = vsel %vm718_vm2, %v833_v5, 0.0  ;;  %928 = vadd.xlane.f32.xlu0 %v904_v24  ;;  %v3166_v13 = vpop.xlane.xlu1 %802  ;;  %v3168_v15 = vpop.xlane.xlu0 %748 }
 0x1da   : > { %4137 = vst [vmem:[#allocation16_spill] sm:$0xff] %v3166_v13  ;;  %4138 = vst [vmem:[#allocation17_spill] sm:$0xff] %v3168_v15  ;;  %v3170_v18 = vpop.eup %2268  ;;  %v866_v34 = vmul.f32 1.442695, %v849_v10  ;;  %v825_v16 = vsel %vm716_vm0, %v3136_v45, %v3166_v13 }
 0x1db   : > { %v841_v23 = vsub.f32 %v2807_v35, %v825_v16  ;;  %v907_v28 = vsel %vm716_vm0, %v3170_v18, 0.0  ;;  %v947_v35 = vsel %vm2813_vm3, %v3149_v62, 0.0  ;;  %v955_v10 = vsel %vm2813_vm3, %v3170_v18, 0.0 }
 0x1dc   : > { %2270 = vpow2.f32 %v866_v34  ;;  %934 = vadd.xlane.f32.xlu1 %v907_v28 }
 0x1dd   : > { %v857_v26 = vsel %vm718_vm2, %v841_v23, 0.0  ;;  %960 = vadd.xlane.f32.xlu0 %v944_v25  ;;  %v3185_v9 = vpop.xlane.xlu1 %1410  ;;  %v3187_v40 = vpop.xlane.xlu0 %764 }
 0x1de   : > { %4139 = vst [vmem:[#allocation18_spill] sm:$0xff] %v3187_v40  ;;  %v882_v6 = vmul.f32 1.442695, %v857_v26 }
 0x1e0   : > { %2272 = vpow2.f32 %v882_v6  ;;  %966 = vadd.xlane.f32.xlu1 %v947_v35 }
 0x1e1   : > { %976 = vadd.xlane.f32.xlu0 %v952_v50  ;;  %v3195_v63 = vpop.xlane.xlu1 %1420  ;;  %v3197_v5 = vpop.xlane.xlu0 %796 }
 0x1e2   : > { %4140 = vst [vmem:[#allocation19_spill] sm:$0xff] %v3195_v63  ;;  %v822_v8 = vsel %vm716_vm0, %v3168_v15, %v3197_v5 }
 0x1e3   : > { %v838_v24 = vsub.f32 %v2838_v44, %v822_v8 }
 0x1e4   : > { %982 = vadd.xlane.f32.xlu1 %v955_v10 }
 0x1e5   : > { %v854_v34 = vsel %vm718_vm2, %v838_v24, 0.0  ;;  %v3209_v16 = vpop.xlane.xlu1 %1416  ;;  %v3211_v23 = vpop.xlane.xlu0 %812 }
 0x1e6   : > { %4141 = vst [vmem:[#allocation20_spill] sm:$0xff] %v3211_v23  ;;  %v3213_v28 = vpop.eup %2270  ;;  %v876_v25 = vmul.f32 1.442695, %v854_v34  ;;  %v830_v44 = vsel %vm716_vm0, %v3187_v40, %v3211_v23 }
 0x1e7   : > { %v846_v26 = vsub.f32 %v2835_v43, %v830_v44  ;;  %v897_v6 = vsel %vm716_vm0, %v3213_v28, 0.0 }
 0x1e8   : > { %2274 = vpow2.f32 %v876_v25  ;;  %914 = vadd.xlane.f32.xlu1 %v897_v6 }
 0x1e9   : > { %v862_v35 = vsel %vm718_vm2, %v846_v26, 0.0  ;;  %v3225_v50 = vpop.xlane.xlu1 %750  ;;  %v3227_v8 = vpop.xlane.xlu0 %1292  ;;  %v945_v26 = vsel %vm2813_vm3, %v3213_v28, 0.0 }
 0x1ea   : > { %4142 = vst [vmem:[#allocation21_spill] sm:$0xff] %v3225_v50  ;;  %4143 = vst [vmem:[#allocation22_spill] sm:$0xff] %v3227_v8  ;;  %v3229_v24 = vpop.eup %2272  ;;  %v892_v10 = vmul.f32 1.442695, %v862_v35 }
 0x1eb   : > { %v905_v34 = vsel %vm716_vm0, %v3229_v24, 0.0  ;;  %v953_v40 = vsel %vm2813_vm3, %v3229_v24, 0.0 }
 0x1ec   : > { %2276 = vpow2.f32 %v892_v10  ;;  %930 = vadd.xlane.f32.xlu1 %v905_v34 }
 0x1ed   : > { %v3234_v44 = vpop.xlane.xlu1 %766  ;;  %v3236_v25 = vpop.xlane.xlu0 %744 }
 0x1ee   : > { %4144 = vst [vmem:[#allocation23_spill] sm:$0xff] %v3234_v44 }
 0x1f0   : > { %962 = vadd.xlane.f32.xlu1 %v945_v26 }
 0x1f1   : > { %v3241_v6 = vpop.xlane.xlu1 %798  ;;  %v3243_v23 = vpop.xlane.xlu0 %760 }
 0x1f2   : > { %4145 = vst [vmem:[#allocation24_spill] sm:$0xff] %v3241_v6  ;;  %4146 = vst [vmem:[#allocation25_spill] sm:$0xff] %v3243_v23  ;;  %v3245_v35 = vpop.eup %2274  ;;  %v823_v10 = vsel %vm716_vm0, %v3225_v50, %v3241_v6 }
 0x1f3   : > { %v839_v34 = vsub.f32 %v2853_v51, %v823_v10  ;;  %v902_v26 = vsel %vm716_vm0, %v3245_v35, 0.0 }
 0x1f4   : > { %978 = vadd.xlane.f32.xlu1 %v953_v40  ;;  %924 = vadd.xlane.f32.xlu0 %v902_v26 }
 0x1f5   : > { %v855_v45 = vsel %vm718_vm2, %v839_v34, 0.0  ;;  %v3260_v8 = vpop.xlane.xlu1 %814  ;;  %v3262_v13 = vpop.xlane.xlu0 %792 }
 0x1f6   : > { %4147 = vst [vmem:[#allocation26_spill] sm:$0xff] %v3260_v8  ;;  %v3264_v50 = vpop.eup %2276  ;;  %v878_v51 = vmul.f32 1.442695, %v855_v45  ;;  %v831_v10 = vsel %vm716_vm0, %v3234_v44, %v3260_v8  ;;  %v820_v40 = vsel %vm716_vm0, %v3236_v25, %v3262_v13 }
 0x1f7   : > { %v847_v26 = vsub.f32 %v2856_v52, %v831_v10  ;;  %v836_v34 = vsub.f32 %v2841_v47, %v820_v40  ;;  %v910_v63 = vsel %vm716_vm0, %v3264_v50, 0.0 }
 0x1f8   : > { %2278 = vpow2.f32 %v878_v51  ;;  %940 = vadd.xlane.f32.xlu0 %v910_v63  ;;  %v950_v63 = vsel %vm2813_vm3, %v3245_v35, 0.0 }
 0x1f9   : > { %v863_v45 = vsel %vm718_vm2, %v847_v26, 0.0  ;;  %v852_v8 = vsel %vm718_vm2, %v836_v34, 0.0  ;;  %v3283_v44 = vpop.xlane.xlu1 %1294  ;;  %v3285_v6 = vpop.xlane.xlu0 %808  ;;  %v958_v34 = vsel %vm2813_vm3, %v3264_v50, 0.0 }
 0x1fa   : > { %4148 = vst [vmem:[#allocation27_spill] sm:$0xff] %v3283_v44  ;;  %4149 = vst [vmem:[#allocation28_spill] sm:$0xff] %v3285_v6  ;;  %v894_v15 = vmul.f32 1.442695, %v863_v45  ;;  %v872_v10 = vmul.f32 1.442695, %v852_v8  ;;  %v828_v47 = vsel %vm716_vm0, %v3243_v23, %v3285_v6 }
 0x1fb   : > { %v844_v51 = vsub.f32 %v2844_v48, %v828_v47 }
 0x1fc   : > { %2280 = vpow2.f32 %v894_v15  ;;  %972 = vadd.xlane.f32.xlu0 %v950_v63 }
 0x1fd   : > { %2282 = vpow2.f32 %v872_v10  ;;  %v860_v40 = vsel %vm718_vm2, %v844_v51, 0.0  ;;  %v3297_v26 = vpop.xlane.xlu1 %746  ;;  %v3384_v31 = vpop.xlane.xlu0 %1288 }
 0x1fe   : > { %4150 = vst [vmem:[#allocation29_spill] sm:$0xff] %v3297_v26  ;;  %v888_v8 = vmul.f32 1.442695, %v860_v40 }
 0x200   : > { %2284 = vpow2.f32 %v888_v8  ;;  %988 = vadd.xlane.f32.xlu0 %v958_v34 }
 0x201   : > { %v3302_v48 = vpop.xlane.xlu1 %762 }
 0x202   : > { %4151 = vst [vmem:[#allocation30_spill] sm:$0xff] %v3302_v48  ;;  %v3304_v45 = vpop.eup %2278 }
 0x203   : > { %v903_v15 = vsel %vm716_vm0, %v3304_v45, 0.0 }
 0x204   : > { %926 = vadd.xlane.f32.xlu1 %v903_v15 }
 0x205   : > { %v3309_v10 = vpop.xlane.xlu1 %794 }
 0x206   : > { %4152 = vst [vmem:[#allocation31_spill] sm:$0xff] %v3309_v10  ;;  %v3311_v47 = vpop.eup %2280  ;;  %v821_v51 = vsel %vm716_vm0, %v3297_v26, %v3309_v10 }
 0x207   : > { %v3317_v63 = vpop.eup %2282  ;;  %v837_v40 = vsub.f32 %v2867_v57, %v821_v51  ;;  %v911_v8 = vsel %vm716_vm0, %v3311_v47, 0.0 }
 0x208   : > { %942 = vadd.xlane.f32.xlu1 %v911_v8  ;;  %v900_v34 = vsel %vm716_vm0, %v3317_v63, 0.0  ;;  %v951_v8 = vsel %vm2813_vm3, %v3304_v45, 0.0 }
 0x209   : > { %v853_v15 = vsel %vm718_vm2, %v837_v40, 0.0  ;;  %920 = vadd.xlane.f32.xlu0 %v900_v34  ;;  %v3328_v23 = vpop.xlane.xlu1 %810 }
 0x20a   : > { %4153 = vst [vmem:[#allocation32_spill] sm:$0xff] %v3328_v23  ;;  %v3330_v6 = vpop.eup %2284  ;;  %v874_v44 = vmul.f32 1.442695, %v853_v15  ;;  %v829_v57 = vsel %vm716_vm0, %v3302_v48, %v3328_v23  ;;  %v959_v48 = vsel %vm2813_vm3, %v3311_v47, 0.0  ;;  %v1690_v23 = vld [vmem:[%s3396_s27 + $0x48] sm:$0xff] }
 0x20b   : > { %v845_v51 = vsub.f32 %v2870_v58, %v829_v57  ;;  %v908_v40 = vsel %vm716_vm0, %v3330_v6, 0.0  ;;  %v948_v57 = vsel %vm2813_vm3, %v3317_v63, 0.0 }
 0x20c   : > { %2286 = vpow2.f32 %v874_v44  ;;  %974 = vadd.xlane.f32.xlu1 %v951_v8  ;;  %v956_v44 = vsel %vm2813_vm3, %v3330_v6, 0.0 }
 0x20d   : > { %v861_v34 = vsel %vm718_vm2, %v845_v51, 0.0  ;;  %936 = vadd.xlane.f32.xlu0 %v908_v40 }
 0x20e   : > { %v890_v15 = vmul.f32 1.442695, %v861_v34 }
 0x210   : > { %2288 = vpow2.f32 %v890_v15  ;;  %990 = vadd.xlane.f32.xlu1 %v959_v48  ;;  %v1405_v48 = vsel %vm1389_vm4, %v2870_v58, 0.0 }
 0x211   : > { %968 = vadd.xlane.f32.xlu0 %v948_v57  ;;  %v1407_v57 = vsel %vm1391_vm6, %v2856_v52, 0.0  ;;  %v1683_v52 = vld [vmem:[%s3396_s27 + $0x10] sm:$0xff] }
 0x215   : > { %984 = vadd.xlane.f32.xlu0 %v956_v44  ;;  %v1277_v44 = vsel %vm1261_vm7, %v2870_v58, 0.0 }
 0x216   : > { %v3354_v8 = vpop.eup %2286 }
 0x217   : > { %4154 = vst [vmem:[#allocation33_spill] sm:$0xff] %v3354_v8  ;;  %v901_v51 = vsel %vm716_vm0, %v3354_v8, 0.0  ;;  %v949_v15 = vsel %vm2813_vm3, %v3354_v8, 0.0 }
 0x218   : > { %922 = vadd.xlane.f32.xlu1 %v901_v51  ;;  %v1278_v51 = vsel %vm1262_vm8, %v2835_v43, 0.0  ;;  %v1681_v43 = vld [vmem:[%s3396_s27] sm:$0xff] }
 0x219   : > { %1434 = vadd.xlane.f32.xlu0 %v1405_v48  ;;  %v3390_v48 = vpop.xlane.xlu0 %1422 }
 0x21a   : > { %v3362_v40 = vpop.eup %2288  ;;  %4156 = vst [vmem:[#allocation35_spill] sm:$0xff] %v3390_v48 }
 0x21b   : > { %4155 = vst [vmem:[#allocation34_spill] sm:$0xff] %v3362_v40  ;;  %v909_v34 = vsel %vm716_vm0, %v3362_v40, 0.0  ;;  %v957_v11 = vsel %vm2813_vm3, %v3362_v40, 0.0  ;;  %vm1662_vm3 = vcmp.ge.s32.totalorder %v2753_v14, 24 }
 0x21c   : > { %938 = vadd.xlane.f32.xlu1 %v909_v34  ;;  %v1687_v34 = vld [vmem:[%s3396_s27 + $0x30] sm:$0xff]  ;;  %vm3595_vm14 = vmand %vm1662_vm3, %vm1663_vm11 }
 0x21d   : > { %1436 = vadd.xlane.f32.xlu0 %v1406_v27  ;;  %v3399_v58 = vpop.xlane.xlu0 %1290  ;;  %v1684_v27 = vld [vmem:[%s3396_s27 + $0x18] sm:$0xff] }
 0x21e   : > { %4157 = vst [vmem:[#allocation36_spill] sm:$0xff] %v3399_v58 }
 0x220   : > { %970 = vadd.xlane.f32.xlu1 %v949_v15  ;;  %v3408_v15 = vpop.xlane.xlu1 %1418 }
 0x221   : > { %1438 = vadd.xlane.f32.xlu0 %v1407_v57  ;;  %v3403_v3 = vpop.xlane.xlu0 %1298  ;;  %4159 = vst [vmem:[#allocation38_spill] sm:$0xff] %v3408_v15 }
 0x222   : > { %4158 = vst [vmem:[#allocation37_spill] sm:$0xff] %v3403_v3  ;;  %v1692_v3 = vld [vmem:[%s3396_s27 + $0x58] sm:$0xff] }
 0x224   : > { %986 = vadd.xlane.f32.xlu1 %v957_v11  ;;  %v1689_v11 = vld [vmem:[%s3396_s27 + $0x40] sm:$0xff] }
 0x225   : > { %v3410_v57 = vpop.xlane.xlu0 %1302 }
 0x228   : > { %1306 = vadd.xlane.f32.xlu1 %v1277_v44  ;;  %v1686_v44 = vld [vmem:[%s3396_s27 + $0x28] sm:$0xff] }
 0x22c   : > { %1308 = vadd.xlane.f32.xlu1 %v1278_v51  ;;  %v1691_v51 = vld [vmem:[%s3396_s27 + $0x50] sm:$0xff] }
 0x230   : > { %1310 = vadd.xlane.f32.xlu1 %v1279_v36  ;;  %v3415_v36 = vpop.xlane.xlu1 %1426 }
 0x231   : > { %4160 = vst [vmem:[#allocation39_spill] sm:$0xff] %v3415_v36  ;;  %v1695_v36 = vld [vmem:[%s3396_s27 + $0x70] sm:$0xff] }
 0x237   : > { %1699 = vperm.xlu0 %2240, %v1681_v43   ;;  %v3417_v43 = vpop.xlane.xlu0 %1432 }
 0x238   : > { %4161 = vst [vmem:[#allocation40_spill] sm:$0xff] %v3417_v43 }
 0x23b   : > { %1709 = vperm.xlu0 %2240, %v1683_v52   ;;  %v1688_v52 = vld [vmem:[%s3396_s27 + $0x38] sm:$0xff] }
 0x23f   : > { %1719 = vperm.xlu0 %2240, %v1685_v7   ;;  %v1693_v7 = vld [vmem:[%s3396_s27 + $0x60] sm:$0xff] }
 0x241   : > { %1704 = vperm.xlu1 %2241, %v1682_v30  }
 0x243   : > { %1729 = vperm.xlu0 %2240, %v1687_v34   ;;  %v1301_v34 = vpop.xlane.xlu1 %1300 }
 0x245   : > { %1714 = vperm.xlu1 %2241, %v1684_v27   ;;  %v1694_v27 = vld [vmem:[%s3396_s27 + $0x68] sm:$0xff] }
 0x247   : > { %1739 = vperm.xlu0 %2240, %v1689_v11   ;;  %v1429_v43 = vpop.xlane.xlu1 %1428 }
 0x249   : > { %1724 = vperm.xlu1 %2241, %v1686_v44  }
 0x24b   : > { %1749 = vperm.xlu0 %2240, %v1691_v51   ;;  %v3430_v15 = vpop.xlane.xlu1 %1430 }
 0x24d   : > { %1734 = vperm.xlu1 %2241, %v1688_v52   ;;  %v917_v30 = vpop.xlane.xlu0 %916  ;;  %v1696_v52 = vld [vmem:[%s3396_s27 + $0x78] sm:$0xff]  ;;  %s3969_s27 = scalar_lea.hbm %s4101_s7, %s4124_s22 }
 0x24e   : > { %2290 = vlog2.f32 %v917_v30 }
 0x24f   : > { %1759 = vperm.xlu0 %2240, %v1693_v7  }
 0x251   : > { %1744 = vperm.xlu1 %2241, %v1690_v23   ;;  %v933_v11 = vpop.xlane.xlu0 %932 }
 0x252   : > { %2292 = vlog2.f32 %v933_v11 }
 0x253   : > { %1764 = vperm.xlu0 %2240, %v1694_v27  }
 0x255   : > { %1754 = vperm.xlu1 %2241, %v1692_v3   ;;  %v965_v44 = vpop.xlane.xlu0 %964 }
 0x256   : > { %v994_v51 = vsel %vm716_vm0, %v917_v30, %v965_v44  ;;  %2294 = vlog2.f32 %v965_v44  ;;  %v3432_v30 = vpop.xlane.xlu1 %1304 }
 0x257   : > { %2296 = vrcp.f32 %v994_v51  ;;  %1769 = vperm.xlu0 %2240, %v1695_v36  }
 0x258   : > { %v2291_v40 = vpop.eup %2290 }
 0x259   : > { %v981_v7 = vpop.xlane.xlu0 %980  ;;  %v1077_v27 = vmul.f32 0.6931472, %v2291_v40 }
 0x25a   : > { %v1002_v23 = vsel %vm716_vm0, %v933_v11, %v981_v7  ;;  %2298 = vlog2.f32 %v981_v7 }
 0x25b   : > { %2300 = vrcp.f32 %v1002_v23  ;;  %1774 = vperm.xlu0 %2240, %v1696_v52   ;;  %v1106_v36 = vadd.f32 %v1077_v27, %v3040_v32 }
 0x25c   : > { %v2293_v3 = vpop.eup %2292 }
 0x25d   : > { %v1093_v44 = vmul.f32 0.6931472, %v2293_v3  ;;  %v1442_v23 = vsub.f32 %v1106_v36, %v3064_v20 }
 0x25f   : > { %v1114_v26 = vadd.f32 %v1093_v44, %v3038_v1 }
 0x260   : > { %v2295_v58 = vpop.eup %2294 }
 0x261   : > { %v2297_v48 = vpop.eup %2296  ;;  %v1125_v51 = vmul.f32 0.6931472, %v2295_v58  ;;  %v913_v10 = vpop.xlane.xlu0 %912  ;;  %v1450_v20 = vsub.f32 %v1114_v26, %v1301_v34 }
 0x262   : > { %v1013_v8 = vmul.f32 %v2297_v48, %v3076_v37 }
 0x263   : > { %v1154_v11 = vadd.f32 %v1125_v51, %v3042_v33 }
 0x264   : > { %v2299_v7 = vpop.eup %2298  ;;  %v1042_v52 = vsel %vm718_vm2, %v1013_v8, 0.0 }
 0x265   : > { %v2301_v40 = vpop.eup %2300  ;;  %1058 = vst [vmem:[%s3443_s28 + $0x10] sm:$0xff] %v1042_v52  ;;  %v1458_v32 = vsub.f32 %v1154_v11, %v3044_v39  ;;  %v1141_v37 = vmul.f32 0.6931472, %v2299_v7  ;;  %v919_v48 = vpop.xlane.xlu1 %918 }
 0x266   : > { %v1029_v33 = vmul.f32 %v2301_v40, %v3085_v4  ;;  %v929_v58 = vpop.xlane.xlu0 %928 }
 0x267   : > { %v3448_v27 = vadd.f32 %v1458_v32, %v1442_v23  ;;  %v1162_v8 = vadd.f32 %v1141_v37, %v3053_v41  ;;  %2302 = vlog2.f32 %v929_v58 }
 0x268   : > { %v1050_v1 = vsel %vm718_vm2, %v1029_v33, 0.0 }
 0x269   : > { %1066 = vst [vmem:[%s3443_s28 + $0x50] sm:$0xff] %v1050_v1  ;;  %v1466_v3 = vsub.f32 %v1162_v8, %v1429_v43  ;;  %v935_v36 = vpop.xlane.xlu1 %934 }
 0x26a   : > { %v961_v44 = vpop.xlane.xlu0 %960  ;;  %2304 = vlog2.f32 %v935_v36 }
 0x26b   : > { %v3454_v51 = vadd.f32 %v1466_v3, %v1450_v20  ;;  %v992_v39 = vsel %vm716_vm0, %v913_v10, %v961_v44 }
 0x26c   : > { %2306 = vrcp.f32 %v992_v39 }
 0x26d   : > { %v967_v4 = vpop.xlane.xlu1 %966 }
 0x26e   : > { %v995_v41 = vsel %vm716_vm0, %v919_v48, %v967_v4  ;;  %v977_v11 = vpop.xlane.xlu0 %976 }
 0x26f   : > { %2308 = vrcp.f32 %v995_v41  ;;  %v1000_v26 = vsel %vm716_vm0, %v929_v58, %v977_v11 }
 0x270   : > { %2310 = vrcp.f32 %v1000_v26 }
 0x271   : > { %2312 = vlog2.f32 %v977_v11  ;;  %v983_v43 = vpop.xlane.xlu1 %982  ;;  %v2303_v7 = vpop.eup %2302 }
 0x272   : > { %v1003_v34 = vsel %vm716_vm0, %v935_v36, %v983_v43  ;;  %2314 = vlog2.f32 %v983_v43  ;;  %v1089_v37 = vmul.f32 0.6931472, %v2303_v7 }
 0x273   : > { %2316 = vrcp.f32 %v1003_v34 }
 0x274   : > { %v2305_v52 = vpop.eup %2304  ;;  %2318 = vlog2.f32 %v961_v44  ;;  %v1112_v44 = vadd.f32 %v1089_v37, %v3074_v56 }
 0x275   : > { %v915_v40 = vpop.xlane.xlu1 %914  ;;  %2320 = vlog2.f32 %v913_v10  ;;  %v1095_v58 = vmul.f32 0.6931472, %v2305_v52 }
 0x276   : > { %v2307_v23 = vpop.eup %2306  ;;  %2322 = vlog2.f32 %v967_v4 }
 0x277   : > { %v1009_v32 = vmul.f32 %v2307_v23, %v3140_v29  ;;  %2324 = vlog2.f32 %v915_v40  ;;  %v1115_v11 = vadd.f32 %v1095_v58, %v3081_v59  ;;  %v1448_v59 = vsub.f32 %v1112_v44, %v3066_v49 }
 0x278   : > { %2326 = vlog2.f32 %v919_v48 }
 0x279   : > { %v2309_v33 = vpop.eup %2308  ;;  %v1040_v8 = vsel %vm718_vm2, %v1009_v32, 0.0  ;;  %v3467_v1 = vpop.xlane.xlu1 %930 }
 0x27a   : > { %v2311_v20 = vpop.eup %2310  ;;  %1056 = vst [vmem:[%s3443_s28] sm:$0xff] %v1040_v8  ;;  %v1015_v3 = vmul.f32 %v2309_v33, %v3149_v62 }
 0x27b   : > { %v2313_v36 = vpop.eup %2312  ;;  %v1025_v10 = vmul.f32 %v2311_v20, %v3155_v38 }
 0x27c   : > { %v2315_v29 = vpop.eup %2314  ;;  %v1043_v39 = vsel %vm718_vm2, %v1015_v3, 0.0  ;;  %v1137_v41 = vmul.f32 0.6931472, %v2313_v36 }
 0x27d   : > { %v2317_v4 = vpop.eup %2316  ;;  %1059 = vst [vmem:[%s3443_s28 + $0x18] sm:$0xff] %v1043_v39  ;;  %v1048_v26 = vsel %vm718_vm2, %v1025_v10, 0.0  ;;  %v1143_v62 = vmul.f32 0.6931472, %v2315_v29  ;;  %v963_v43 = vpop.xlane.xlu1 %962 }
 0x27e   : > { %1064 = vst [vmem:[%s3443_s28 + $0x40] sm:$0xff] %v1048_v26  ;;  %v1160_v38 = vadd.f32 %v1137_v41, %v3099_v2  ;;  %v1031_v48 = vmul.f32 %v2317_v4, %v3170_v18  ;;  %v993_v56 = vsel %vm716_vm0, %v915_v40, %v963_v43  ;;  %v2319_v34 = vpop.eup %2318  ;;  %v1451_v2 = vsub.f32 %v1115_v11, %v3410_v57  ;;  %v1534_v4 = vld [vmem:[%s3510_s18] sm:$0xff] }
 0x27f   : > { %v1163_v7 = vadd.f32 %v1143_v62, %v3118_v19  ;;  %2328 = vrcp.f32 %v993_v56  ;;  %v2321_v32 = vpop.eup %2320  ;;  %v1121_v19 = vmul.f32 0.6931472, %v2319_v34  ;;  %v1538_v56 = vld [vmem:[%s3510_s18 + $0x20] sm:$0xff] }
 0x280   : > { %v1464_v52 = vsub.f32 %v1160_v38, %v3068_v53  ;;  %v1051_v23 = vsel %vm718_vm2, %v1031_v48, 0.0  ;;  %2330 = vlog2.f32 %v963_v43  ;;  %v2323_v53 = vpop.eup %2322  ;;  %v1073_v8 = vmul.f32 0.6931472, %v2321_v32  ;;  %v1536_v43 = vld [vmem:[%s3510_s18 + $0x10] sm:$0xff] }
 0x281   : > { %1067 = vst [vmem:[%s3443_s28 + $0x58] sm:$0xff] %v1051_v23  ;;  %v1467_v18 = vsub.f32 %v1163_v7, %v3430_v15  ;;  %v3492_v40 = vpop.xlane.xlu1 %978  ;;  %v3494_v37 = vpop.xlane.xlu0 %924  ;;  %v1152_v3 = vadd.f32 %v1121_v19, %v3083_v60  ;;  %v1127_v36 = vmul.f32 0.6931472, %v2323_v53  ;;  %v2387_v23 = vld [vmem:[%s2781_s20 + $0x10] sm:$0xff]  ;;  %v2388_v19 = vld [vmem:[%s2781_s20 + $0x20] sm:$0xff] }
 0x282   : > { %v3496_v33 = vadd.f32 %v1464_v52, %v1448_v59  ;;  %v1001_v49 = vsel %vm716_vm0, %v3467_v1, %v3492_v40  ;;  %v2325_v57 = vpop.eup %2324  ;;  %v1104_v29 = vadd.f32 %v1073_v8, %v3070_v54  ;;  %v1552_v32 = vsub.f32 %v2387_v23, %v1536_v43 }
 0x283   : > { %v3502_v58 = vadd.f32 %v1467_v18, %v1451_v2  ;;  %2332 = vrcp.f32 %v1001_v49  ;;  %v2327_v15 = vpop.eup %2326  ;;  %v1075_v10 = vmul.f32 0.6931472, %v2325_v57  ;;  %v1456_v26 = vsub.f32 %v1152_v3, %v3120_v22  ;;  %v1535_v57 = vld [vmem:[%s3510_s18 + $0x8] sm:$0xff] }
 0x284   : > { %v1079_v39 = vmul.f32 0.6931472, %v2327_v15  ;;  %v1155_v54 = vadd.f32 %v1127_v36, %v3097_v0  ;;  %v1440_v34 = vsub.f32 %v1104_v29, %v3055_v12  ;;  %v3543_v49 = vsub.f32 %v2388_v19, %v1538_v56  ;;  %v2389_v29 = vld [vmem:[%s2781_s20 + $0x8] sm:$0xff]  ;;  %v1542_v56 = vld [vmem:[%s3510_s18 + $0x40] sm:$0xff] }
 0x285   : > { %v3504_v20 = vpop.xlane.xlu0 %940  ;;  %v1105_v38 = vadd.f32 %v1075_v10, %v3138_v46 }
 0x286   : > { %v1107_v52 = vadd.f32 %v1079_v39, %v3072_v55  ;;  %v1472_v2 = vadd.f32 %v1456_v26, %v1440_v34  ;;  %v1459_v55 = vsub.f32 %v1155_v54, %v3132_v17  ;;  %v2390_v39 = vld [vmem:[%s2781_s20 + $0x30] sm:$0xff] }
 0x288   : > { %v1443_v36 = vsub.f32 %v1107_v52, %v3134_v42 }
 0x289   : > { %v2329_v44 = vpop.eup %2328  ;;  %v3514_v41 = vpop.xlane.xlu0 %972 }
 0x28a   : > { %v2331_v11 = vpop.eup %2330  ;;  %v1011_v62 = vmul.f32 %v2329_v44, %v3213_v28  ;;  %v998_v60 = vsel %vm716_vm0, %v3494_v37, %v3514_v41  ;;  %v2386_v28 = vld [vmem:[%s2781_s20] sm:$0xff]  ;;  %v1551_v44 = vsub.f32 %v2389_v29, %v1535_v57  ;;  %v1475_v42 = vadd.f32 %v1459_v55, %v1443_v36 }
 0x28b   : > { %v1123_v48 = vmul.f32 0.6931472, %v2331_v11  ;;  %2334 = vrcp.f32 %v998_v60  ;;  %v1550_v7 = vsub.f32 %v2386_v28, %v1534_v4  ;;  %v1490_v11 = vsel %vm1489_vm10, %v1472_v2, 0.0  ;;  %v2392_v57 = vld [vmem:[%s2781_s20 + $0x40] sm:$0xff] }
 0x28c   : > { %v1041_v22 = vsel %vm718_vm2, %v1011_v62, 0.0  ;;  %v1570_v62 = vand.u32 2147483647, %v3543_v49  ;;  %v1495_v19 = vsel %vm1489_vm10, %v1475_v42, 0.0  ;;  %v1599_v55 = vmul.f32 4.5, %v1551_v44 }
 0x28d   : > { %v2333_v59 = vpop.eup %2332  ;;  %1057 = vst [vmem:[%s3443_s28 + $0x8] sm:$0xff] %v1041_v22  ;;  %v1153_v0 = vadd.f32 %v1123_v48, %v3145_v21  ;;  %v3534_v46 = vpop.xlane.xlu0 %988  ;;  %v1441_v21 = vsub.f32 %v1105_v38, %v3147_v61  ;;  %v1566_v15 = vand.u32 2147483647, %v1550_v7  ;;  %v1598_v3 = vmul.f32 4.5, %v1550_v7  ;;  %v1537_v48 = vld [vmem:[%s3510_s18 + $0x18] sm:$0xff] }
 0x28e   : > { %v1027_v12 = vmul.f32 %v2333_v59, %v3229_v24  ;;  %v1006_v18 = vsel %vm716_vm0, %v3504_v20, %v3534_v46  ;;  %v1540_v24 = vld [vmem:[%s3510_s18 + $0x30] sm:$0xff]  ;;  %v1568_v61 = vand.u32 2147483647, %v1552_v32  ;;  %v1602_v38 = vmul.f32 4.5, %v3543_v49 }
 0x28f   : > { %v1457_v53 = vsub.f32 %v1153_v0, %v3185_v9  ;;  %2336 = vrcp.f32 %v1006_v18  ;;  %v1600_v9 = vmul.f32 4.5, %v1552_v32  ;;  %v3560_v4 = vsub.f32 %v2390_v39, %v1540_v24 }
 0x290   : > { %v1049_v8 = vsel %vm718_vm2, %v1027_v12, 0.0  ;;  %v1614_v43 = vmul.f32 %v1598_v3, %v1550_v7  ;;  %v2076_v54 = vadd.f32 -0.055555556, %v1566_v15  ;;  %v1493_v22 = vsel %vm1489_vm10, %v3448_v27, 0.0  ;;  %v1539_v7 = vld [vmem:[%s3510_s18 + $0x28] sm:$0xff] }
 0x291   : > { %v1473_v10 = vadd.f32 %v1457_v53, %v1441_v21  ;;  %1065 = vst [vmem:[%s3443_s28 + $0x48] sm:$0xff] %v1049_v8  ;;  %v3555_v17 = vpop.xlane.xlu1 %926  ;;  %vm3572_vm12 = vcmp.lt.f32.partialorder %v1566_v15, 0.11111111  ;;  %v1616_v52 = vmul.f32 %v1600_v9, %v1552_v32  ;;  %v2078_v0 = vadd.f32 -0.055555556, %v1568_v61  ;;  %v2391_v21 = vld [vmem:[%s2781_s20 + $0x18] sm:$0xff] }
 0x292   : > { %vm3578_vm13 = vcmp.lt.f32.partialorder %v1568_v61, 0.11111111  ;;  %v1567_v27 = vand.u32 2147483647, %v1551_v44  ;;  %v1553_v53 = vsub.f32 %v2391_v21, %v1537_v48  ;;  %v1558_v32 = vsub.f32 %v2392_v57, %v1542_v56  ;;  %v2393_v3 = vld [vmem:[%s2781_s20 + $0x28] sm:$0xff]  ;;  %v2394_v57 = vld [vmem:[%s2781_s20 + $0x50] sm:$0xff] }
 0x293   : > { %v1491_v26 = vsel %vm1489_vm10, %v1473_v10, 0.0  ;;  %v1555_v36 = vsub.f32 %v2393_v3, %v1539_v7  ;;  %v1648_v9 = vsel %vm3578_vm13, %v1616_v52, %v2078_v0  ;;  %vm3605_vm15 = vcmp.lt.f32.partialorder %v1570_v62, 0.11111111 }
 0x294   : > { %v1492_v60 = vadd.f32 %v1491_v26, %v1490_v11  ;;  %v1618_v39 = vmul.f32 %v1602_v38, %v3543_v49  ;;  %v2080_v11 = vadd.f32 -0.055555556, %v1570_v62  ;;  %vm3617_vm1 = vcmp.lt.f32.partialorder %v1567_v27, 0.11111111 }
 0x295   : > { %v2335_v34 = vpop.eup %2334  ;;  %v3570_v28 = vpop.xlane.xlu1 %942  ;;  %v3626_v62 = vmul.f32 %v1599_v55, %v1551_v44  ;;  %v3634_v48 = vsel %vm3595_vm14, %v1648_v9, 0.0  ;;  %v1604_v56 = vmul.f32 4.5, %v3560_v4  ;;  %v1601_v52 = vmul.f32 4.5, %v1553_v53 }
 0x296   : > { %v1494_v23 = vadd.f32 %v1493_v22, %v1492_v60  ;;  %v1021_v2 = vmul.f32 %v2335_v34, %v3245_v35  ;;  %v921_v12 = vpop.xlane.xlu0 %920  ;;  %v1646_v35 = vsel %vm3572_vm12, %v1614_v43, %v2076_v54  ;;  %v1572_v54 = vand.u32 2147483647, %v3560_v4  ;;  %v1544_v22 = vld [vmem:[%s3510_s18 + $0x50] sm:$0xff] }
 0x297   : > { %v3624_v49 = vsel %vm3595_vm14, %v1646_v35, 0.0  ;;  %v1569_v34 = vand.u32 2147483647, %v1553_v53  ;;  %v1650_v44 = vsel %vm3605_vm15, %v1618_v39, %v2080_v11  ;;  %v1574_v0 = vand.u32 2147483647, %v1558_v32  ;;  %v1541_v11 = vld [vmem:[%s3510_s18 + $0x38] sm:$0xff] }
 0x298   : > { %v1046_v24 = vsel %vm718_vm2, %v1021_v2, 0.0  ;;  %v3587_v8 = vadd.f32 %v1495_v19, %v1494_v23  ;;  %v1606_v7 = vmul.f32 4.5, %v1558_v32  ;;  %vm3647_vm4 = vcmp.lt.f32.partialorder %v1572_v54, 0.11111111 }
 0x299   : > { %v2337_v10 = vpop.eup %2336  ;;  %1062 = vst [vmem:[%s3443_s28 + $0x30] sm:$0xff] %v1046_v24  ;;  %v3601_v61 = vpop.xlane.xlu1 %974  ;;  %v1603_v19 = vmul.f32 4.5, %v1555_v36  ;;  %v2082_v21 = vadd.f32 -0.055555556, %v1572_v54  ;;  %v1560_v24 = vsub.f32 %v2394_v57, %v1544_v22  ;;  %v1620_v35 = vmul.f32 %v1604_v56, %v3560_v4  ;;  %v2395_v22 = vld [vmem:[%s2781_s20 + $0x38] sm:$0xff] }
 0x29a   : > { %v1037_v42 = vmul.f32 %v2337_v10, %v3264_v50  ;;  %v999_v26 = vsel %vm716_vm0, %v3555_v17, %v3601_v61  ;;  %v3615_v60 = vpop.xlane.xlu0 %936  ;;  %v3628_v50 = vadd.f32 -0.055555556, %v1567_v27  ;;  %v1571_v27 = vand.u32 2147483647, %v1555_v36 }
 0x29b   : > { %2338 = vrcp.f32 %v999_v26  ;;  %vm3655_vm5 = vcmp.lt.f32.partialorder %v1569_v34, 0.11111111  ;;  %v2079_v10 = vadd.f32 -0.055555556, %v1569_v34  ;;  %v1617_v9 = vmul.f32 %v1601_v52, %v1553_v53  ;;  %v1547_v53 = vld [vmem:[%s3510_s18 + $0x68] sm:$0xff] }
 0x29c   : > { %v1054_v38 = vsel %vm718_vm2, %v1037_v42, 0.0  ;;  %v1622_v29 = vmul.f32 %v1606_v7, %v1558_v32  ;;  %v2084_v39 = vadd.f32 -0.055555556, %v1574_v0  ;;  %vm3662_vm6 = vcmp.lt.f32.partialorder %v1574_v0, 0.11111111 }
 0x29d   : > { %1070 = vst [vmem:[%s3443_s28 + $0x70] sm:$0xff] %v1054_v38  ;;  %v3639_v59 = vpop.xlane.xlu1 %990  ;;  %v1619_v4 = vmul.f32 %v1603_v19, %v1555_v36  ;;  %v2081_v54 = vadd.f32 -0.055555556, %v1571_v27  ;;  %vm3670_vm7 = vcmp.lt.f32.partialorder %v1571_v27, 0.11111111  ;;  %v1608_v56 = vmul.f32 4.5, %v1560_v24 }
 0x29e   : > { %v1007_v23 = vsel %vm716_vm0, %v3570_v28, %v3639_v59  ;;  %v969_v2 = vpop.xlane.xlu0 %968  ;;  %v1576_v32 = vand.u32 2147483647, %v1560_v24  ;;  %v3677_v34 = vsel %vm3595_vm14, %v1650_v44, 0.0  ;;  %v1647_v36 = vsel %vm3617_vm1, %v3626_v62, %v3628_v50  ;;  %v2396_v50 = vld [vmem:[%s2781_s20 + $0x60] sm:$0xff] }
 0x29f   : > { %2340 = vrcp.f32 %v1007_v23  ;;  %v996_v55 = vsel %vm716_vm0, %v921_v12, %v969_v2  ;;  %v1557_v52 = vsub.f32 %v2395_v22, %v1541_v11  ;;  %v1652_v23 = vsel %vm3647_vm4, %v1620_v35, %v2082_v21  ;;  %v2397_v22 = vld [vmem:[%s2781_s20 + $0x48] sm:$0xff] }
 0x2a0   : > { %2342 = vrcp.f32 %v996_v55  ;;  %v1654_v44 = vsel %vm3662_vm6, %v1622_v29, %v2084_v39  ;;  %vm3701_vm8 = vcmp.lt.f32.partialorder %v1576_v32, 0.11111111  ;;  %v1624_v19 = vmul.f32 %v1608_v56, %v1560_v24 }
 0x2a1   : > { %2344 = vlog2.f32 %v969_v2  ;;  %v1649_v2 = vsel %vm3655_vm5, %v1617_v9, %v2079_v10  ;;  %v2086_v55 = vadd.f32 -0.055555556, %v1576_v32  ;;  %v1605_v21 = vmul.f32 4.5, %v1557_v52  ;;  %v1543_v9 = vld [vmem:[%s3510_s18 + $0x48] sm:$0xff] }
 0x2a2   : > { %2346 = vlog2.f32 %v921_v12  ;;  %v3660_v42 = vpop.xlane.xlu0 %984  ;;  %v1546_v12 = vld [vmem:[%s3510_s18 + $0x60] sm:$0xff]  ;;  %v3716_v24 = vsel %vm3595_vm14, %v1652_v23, 0.0  ;;  %v3720_v3 = vsel %vm3595_vm14, %v1649_v2, 0.0  ;;  %v3724_v10 = vsel %vm3595_vm14, %v1654_v44, 0.0 }
 0x2a3   : > { %v1004_v38 = vsel %vm716_vm0, %v3615_v60, %v3660_v42  ;;  %v3698_v27 = vsub.f32 %v2396_v50, %v1546_v12 }
 0x2a4   : > { %2348 = vrcp.f32 %v1004_v38  ;;  %v1656_v38 = vsel %vm3701_vm8, %v1624_v19, %v2086_v55 }
 0x2a5   : > { %v2339_v0 = vpop.eup %2338  ;;  %2350 = vlog2.f32 %v3494_v37  ;;  %v923_v7 = vpop.xlane.xlu1 %922  ;;  %v1651_v37 = vsel %vm3670_vm7, %v1619_v4, %v2081_v54  ;;  %v4123_v26 = vand.u32 2147483647, %v3698_v27 }
 0x2a6   : > { %2352 = vlog2.f32 %v3514_v41  ;;  %v1023_v43 = vmul.f32 %v2339_v0, %v3304_v45  ;;  %v3693_v62 = vpop.xlane.xlu0 %1434  ;;  %v1573_v41 = vand.u32 2147483647, %v1557_v52  ;;  %v3731_v11 = vsel %vm3595_vm14, %v1651_v37, 0.0  ;;  %v2398_v37 = vld [vmem:[%s2781_s20 + $0x68] sm:$0xff] }
 0x2a7   : > { %2354 = vlog2.f32 %v3601_v61  ;;  %v3712_v61 = vsel %vm3595_vm14, %v1647_v36, 0.0  ;;  %v1621_v36 = vmul.f32 %v1605_v21, %v1557_v52  ;;  %v3758_v50 = vsub.f32 %v2398_v37, %v1547_v53 }
 0x2a8   : > { %v1047_v45 = vsel %vm718_vm2, %v1023_v43, 0.0  ;;  %2356 = vlog2.f32 %v923_v7  ;;  %vm3750_vm9 = vcmp.lt.f32.partialorder %v1573_v41, 0.11111111 }
 0x2a9   : > { %v2341_v57 = vpop.eup %2340  ;;  %1063 = vst [vmem:[%s3443_s28 + $0x38] sm:$0xff] %v1047_v45  ;;  %v3708_v35 = vpop.xlane.xlu1 %938  ;;  %2358 = vlog2.f32 %v3555_v17  ;;  %v1610_v17 = vmul.f32 4.5, %v3698_v27 }
 0x2aa   : > { %v2343_v29 = vpop.eup %2342  ;;  %v1039_v39 = vmul.f32 %v2341_v57, %v3311_v47  ;;  %2360 = vlog2.f32 %v3492_v40  ;;  %v1545_v47 = vld [vmem:[%s3510_s18 + $0x58] sm:$0xff]  ;;  %v3743_v12 = vpop.xlane.xlu0 %1436  ;;  %v2083_v40 = vadd.f32 -0.055555556, %v1573_v41  ;;  %v3766_v41 = vsel %vm3595_vm14, %v1656_v38, 0.0 }
 0x2ab   : > { %v2345_v4 = vpop.eup %2344  ;;  %v1017_v54 = vmul.f32 %v2343_v29, %v3317_v63  ;;  %v1559_v63 = vsub.f32 %v2397_v22, %v1543_v9  ;;  %2362 = vlog2.f32 %v3467_v1  ;;  %v2399_v1 = vld [vmem:[%s2781_s20 + $0x58] sm:$0xff]  ;;  %4184 = vst [vmem:[#allocation41_spill] sm:$0xff] %v3766_v41  ;;  %v3771_v57 = vmul.f32 %v1610_v17, %v3698_v27  ;;  %v4197_v22 = vld [vmem:[#allocation36_spill] sm:$0xff]  ;;  %v4202_v41 = vld [vmem:[#allocation39_spill] sm:$0xff] }
 0x2ac   : > { %v2347_v32 = vpop.eup %2346  ;;  %v1055_v56 = vsel %vm718_vm2, %v1039_v39, 0.0  ;;  %v1129_v23 = vmul.f32 0.6931472, %v2345_v4  ;;  %v3761_v18 = vsub.f32 %v2399_v1, %v1545_v47  ;;  %v3775_v9 = vadd.f32 -0.055555556, %v4123_v26 }
 0x2ad   : > { %1071 = vst [vmem:[%s3443_s28 + $0x78] sm:$0xff] %v1055_v56  ;;  %v1044_v0 = vsel %vm718_vm2, %v1017_v54, 0.0  ;;  %v971_v2 = vpop.xlane.xlu1 %970  ;;  %v1081_v55 = vmul.f32 0.6931472, %v2347_v32  ;;  %v1575_v29 = vand.u32 2147483647, %v1559_v63 }
 0x2ae   : > { %v2349_v43 = vpop.eup %2348  ;;  %1060 = vst [vmem:[%s3443_s28 + $0x20] sm:$0xff] %v1044_v0  ;;  %v997_v52 = vsel %vm716_vm0, %v923_v7, %v971_v2  ;;  %2364 = vlog2.f32 %v971_v2  ;;  %v1653_v7 = vsel %vm3750_vm9, %v1621_v36, %v2083_v40  ;;  %v1607_v38 = vmul.f32 4.5, %v1559_v63  ;;  %v3783_v17 = vpop.xlane.xlu0 %1438 }
 0x2af   : > { %v2351_v19 = vpop.eup %2350  ;;  %v1033_v45 = vmul.f32 %v2349_v43, %v3330_v6  ;;  %2366 = vrcp.f32 %v997_v52  ;;  %v1156_v6 = vadd.f32 %v1129_v23, %v3262_v13  ;;  %v4122_v32 = vand.u32 2147483647, %v3758_v50 }
 0x2b0   : > { %v2353_v21 = vpop.eup %2352  ;;  %2368 = vlog2.f32 %v3615_v60  ;;  %v1611_v60 = vmul.f32 4.5, %v3758_v50  ;;  %v1108_v56 = vadd.f32 %v1081_v55, %v3236_v25  ;;  %v3793_v36 = vsel %vm3595_vm14, %v1653_v7, 0.0  ;;  %v4187_v7 = vld [vmem:[#allocation17_spill] sm:$0xff] }
 0x2b1   : > { %v2355_v39 = vpop.eup %2354  ;;  %v1052_v4 = vsel %vm718_vm2, %v1033_v45, 0.0  ;;  %v987_v54 = vpop.xlane.xlu1 %986  ;;  %2370 = vlog2.f32 %v3660_v42  ;;  %v1133_v13 = vmul.f32 0.6931472, %v2353_v21  ;;  %v1085_v42 = vmul.f32 0.6931472, %v2351_v19 }
 0x2b2   : > { %v2357_v53 = vpop.eup %2356  ;;  %1068 = vst [vmem:[%s3443_s28 + $0x60] sm:$0xff] %v1052_v4  ;;  %v1005_v47 = vsel %vm716_vm0, %v3708_v35, %v987_v54  ;;  %vm3795_vm3 = vcmp.lt.f32.partialorder %v1575_v29, 0.11111111  ;;  %v2085_v0 = vadd.f32 -0.055555556, %v1575_v29  ;;  %v1460_v44 = vsub.f32 %v1156_v6, %v3209_v16  ;;  %v4188_v6 = vld [vmem:[#allocation24_spill] sm:$0xff] }
 0x2b3   : > { %2372 = vrcp.f32 %v1005_v47  ;;  %v2359_v40 = vpop.eup %2358  ;;  %v1135_v2 = vmul.f32 0.6931472, %v2355_v39  ;;  %v1083_v25 = vmul.f32 0.6931472, %v2357_v53  ;;  %v1623_v37 = vmul.f32 %v1607_v38, %v1559_v63  ;;  %v4189_v38 = vld [vmem:[#allocation29_spill] sm:$0xff] }
 0x2b4   : > { %2374 = vlog2.f32 %v987_v54  ;;  %v2361_v23 = vpop.eup %2360  ;;  %v3807_v1 = vmul.f32 %v1611_v60, %v3758_v50  ;;  %v3811_v19 = vadd.f32 -0.055555556, %v4122_v32  ;;  %v1087_v16 = vmul.f32 0.6931472, %v2359_v40  ;;  %v1548_v47 = vld [vmem:[%s3510_s18 + $0x70] sm:$0xff] }
 0x2b5   : > { %2376 = vlog2.f32 %v3504_v20  ;;  %v3801_v43 = vpop.xlane.xlu1 %1306  ;;  %v2363_v55 = vpop.eup %2362  ;;  %v1158_v20 = vadd.f32 %v1133_v13, %v3197_v5  ;;  %v1444_v45 = vsub.f32 %v1108_v56, %v3384_v31  ;;  %v1139_v21 = vmul.f32 0.6931472, %v2361_v23  ;;  %v4190_v60 = vld [vmem:[#allocation33_spill] sm:$0xff] }
 0x2b6   : > { %2378 = vlog2.f32 %v3708_v35  ;;  %v3804_v52 = vpop.permute.xlu0 %1699  ;;  %v1110_v63 = vadd.f32 %v1085_v42, %v4187_v7  ;;  %v1159_v4 = vadd.f32 %v1135_v2, %v4188_v6  ;;  %v1109_v5 = vadd.f32 %v1083_v25, %v4189_v38  ;;  %v4191_v42 = vld [vmem:[#allocation19_spill] sm:$0xff]  ;;  %v4192_v2 = vld [vmem:[#allocation21_spill] sm:$0xff] }
 0x2b7   : > { %2380 = vlog2.f32 %v3534_v46  ;;  %v1476_v54 = vadd.f32 %v1460_v44, %v1444_v45  ;;  %v1091_v31 = vmul.f32 0.6931472, %v2363_v55  ;;  %v3827_v56 = vmul.f32 4.5, %v3761_v18  ;;  %v4193_v25 = vld [vmem:[#allocation31_spill] sm:$0xff]  ;;  %v1549_v55 = vld [vmem:[%s3510_s18 + $0x78] sm:$0xff]  ;;  %v2400_v32 = vld [vmem:[%s2781_s20 + $0x70] sm:$0xff] }
 0x2b8   : > { %v2365_v35 = vpop.eup %2364  ;;  %2382 = vlog2.f32 %v3570_v28  ;;  %v1462_v23 = vsub.f32 %v1158_v20, %v4191_v42  ;;  %v1111_v44 = vadd.f32 %v1087_v16, %v4192_v2  ;;  %v3840_v26 = vsub.f32 %v2400_v32, %v1548_v47  ;;  %v4196_v16 = vld [vmem:[#allocation35_spill] sm:$0xff]  ;;  %s2532_s18 = smov [#allocation2]  }
 0x2b9   : > { %v2367_v39 = vpop.eup %2366  ;;  %v1131_v53 = vmul.f32 0.6931472, %v2365_v35  ;;  %v3821_v46 = vpop.xlane.xlu1 %1308  ;;  %2384 = vlog2.f32 %v3639_v59  ;;  %v1655_v35 = vsel %vm3795_vm3, %v1623_v37, %v2085_v0  ;;  %v4194_v59 = vld [vmem:[#allocation16_spill] sm:$0xff]  ;;  %v1463_v42 = vsub.f32 %v1159_v4, %v4196_v16  ;;  %v4198_v37 = vld [vmem:[#allocation38_spill] sm:$0xff]  ;;  %s2406_s12 = sshll.u32 %s2532_s18, 4  ;;  %s2407_s12 = int_to_ptr.vmem [resolvable:$false] %s2406_s12 }
 0x2ba   : > { %v1019_v13 = vmul.f32 %v2367_v39, %v4190_v60  ;;  %v1710_v28 = vpop.permute.xlu0 %1709  ;;  %v2369_v40 = vpop.eup %2368  ;;  %v1161_v6 = vadd.f32 %v1139_v21, %v4194_v59  ;;  %v4195_v39 = vld [vmem:[#allocation22_spill] sm:$0xff]  ;;  %v1445_v0 = vsub.f32 %v1109_v5, %v4197_v22  ;;  %v3853_v32 = vsel %vm3595_vm14, %v1655_v35, 0.0  ;;  %p2409_p1 = scmp.lt.s32.totalorder %s3971_s29, %s2407_s12 }
 0x2bb   : > { %v1157_v45 = vadd.f32 %v1131_v53, %v4193_v25  ;;  %v2371_v7 = vpop.eup %2370  ;;  %v1446_v38 = vsub.f32 %v1110_v63, %v4195_v39  ;;  %v1497_v53 = vsel %vm1489_vm10, %v1476_v54, 0.0  ;;  %v4199_v25 = vld [vmem:[#allocation15_spill] sm:$0xff]  ;;  %v4200_v39 = vld [vmem:[#allocation34_spill] sm:$0xff]  ;;  %v1509_v35 = vsel %vm1489_vm10, %v3454_v51, 0.0 }
 0x2bc   : > { %v1045_v60 = vsel %vm718_vm2, %v1019_v13, 0.0  ;;  %v1113_v59 = vadd.f32 %v1091_v31, %v4199_v25  ;;  %v2401_v4 = vld [vmem:[%s2781_s20 + $0x78] sm:$0xff]  ;;  %v1145_v16 = vmul.f32 0.6931472, %v2371_v7  ;;  %v1465_v31 = vsub.f32 %v1161_v6, %v4202_v41  ;;  %s2408_s20 = scalar_lea.vmem %s2407_s12, 4096 }
 0x2bd   : > { %v2373_v20 = vpop.eup %2372  ;;  %1061 = vst [vmem:[%s3443_s28 + $0x28] sm:$0xff] %v1045_v60  ;;  %v1461_v2 = vsub.f32 %v1157_v45, %v4198_v37  ;;  %v3847_v21 = vpop.xlane.xlu1 %1310  ;;  %v3856_v54 = vsub.f32 %v2401_v4, %v1549_v55  ;;  %v1478_v47 = vadd.f32 %v1462_v23, %v1446_v38  ;;  %v4201_v60 = vld [vmem:[#allocation27_spill] sm:$0xff]  ;;  %v1097_v4 = vmul.f32 0.6931472, %v2369_v40  ;;  %p2410_p3 = scmp.lt.s32.totalorder %s2408_s20, %s2402_s11 }
 0x2be   : > { %v2375_v63 = vpop.eup %2374  ;;  %v1035_v13 = vmul.f32 %v2373_v20, %v4200_v39  ;;  %v1720_v29 = vpop.permute.xlu0 %1719  ;;  %v1447_v45 = vsub.f32 %v1111_v44, %v4201_v60  ;;  %v1498_v20 = vadd.f32 %v1497_v53, %v3587_v8  ;;  %v1777_v8 = vmul.f32 %v3804_v52, %v3624_v49  ;;  %v4204_v53 = vld [vmem:[#allocation28_spill] sm:$0xff] }
 0x2bf   : > { %v2377_v5 = vpop.eup %2376  ;;  %v1477_v22 = vadd.f32 %v1461_v2, %v1445_v0  ;;  %v1147_v44 = vmul.f32 0.6931472, %v2375_v63  ;;  %v4203_v0 = vld [vmem:[#allocation37_spill] sm:$0xff]  ;;  %v1501_v51 = vsel %vm1489_vm10, %v1478_v47, 0.0  ;;  %v4206_v52 = vld [vmem:[#allocation32_spill] sm:$0xff]  ;;  %p2411_p4 = por %p2410_p3, %p2409_p1 }
 0x2c0   : > { %v2379_v37 = vpop.eup %2378  ;;  %v1053_v25 = vsel %vm718_vm2, %v1035_v13, 0.0  ;;  %v1479_v55 = vadd.f32 %v1463_v42, %v1447_v45  ;;  %v1449_v2 = vsub.f32 %v1113_v59, %v4203_v0  ;;  %v1164_v42 = vadd.f32 %v1145_v16, %v4204_v53 }
 0x2c1   : > { %v2381_v39 = vpop.eup %2380  ;;  %v1499_v23 = vsel %vm1489_vm10, %v1477_v22, 0.0  ;;  %1069 = vst [vmem:[%s3443_s28 + $0x68] sm:$0xff] %v1053_v25  ;;  %v1705_v7 = vpop.permute.xlu1 %1704  ;;  %v1099_v40 = vmul.f32 0.6931472, %v2379_v37  ;;  %v1101_v13 = vmul.f32 0.6931472, %v2377_v5  ;;  %v1779_v22 = vmul.f32 %v1710_v28, %v3634_v48  ;;  %p2412_p7 = pnand %p2411_p4, %p2405_p0 }
 0x2c2   : > { %v2383_v38 = vpop.eup %2382  ;;  %v1500_v41 = vadd.f32 %v1499_v23, %v1498_v20  ;;  %v1778_v14 = vmul.f32 %v1705_v7, %v3712_v61  ;;  %v1730_v6 = vpop.permute.xlu0 %1729  ;;  %v1481_v45 = vadd.f32 %v1465_v31, %v1449_v2  ;;  %v1503_v59 = vsel %vm1489_vm10, %v1479_v55, 0.0  ;;  %v4205_v20 = vld [vmem:[#allocation25_spill] sm:$0xff]  ;;  %v4207_v2 = vld [vmem:[#allocation40_spill] sm:$0xff] }
 0x2c3   : > { %v2385_v60 = vpop.eup %2384  ;;  %v1116_v23 = vadd.f32 %v1097_v4, %v4205_v20  ;;  %v1149_v49 = vmul.f32 0.6931472, %v2381_v39  ;;  %v1165_v61 = vadd.f32 %v1147_v44, %v4206_v52  ;;  %v1103_v47 = vmul.f32 0.6931472, %v2383_v38  ;;  %v4212_v38 = vld [vmem:[#allocation18_spill] sm:$0xff] }
 0x2c4   : > { %v1502_v63 = vadd.f32 %v1501_v51, %v1500_v41  ;;  %v1794_v25 = vadd.f32 %v1778_v14, %v1777_v8  ;;  %v1505_v31 = vsel %vm1489_vm10, %v3496_v33, 0.0  ;;  %v1468_v48 = vsub.f32 %v1164_v42, %v4207_v2  ;;  %v4208_v41 = vld [vmem:[#allocation30_spill] sm:$0xff] }
 0x2c5   : > { %v1715_v7 = vpop.permute.xlu1 %1714  ;;  %v1151_v28 = vmul.f32 0.6931472, %v2385_v60  ;;  %v1117_v55 = vadd.f32 %v1099_v40, %v4208_v41  ;;  %v4209_v4 = vand.u32 2147483647, %v3761_v18  ;;  %v1118_v8 = vadd.f32 %v1101_v13, %v4212_v38  ;;  %v4219_v13 = vld [vmem:[#allocation20_spill] sm:$0xff]  ;;  %v4221_v52 = vld [vmem:[#allocation26_spill] sm:$0xff] }
 0x2c6   : > { %v1504_v0 = vadd.f32 %v1503_v59, %v1502_v63  ;;  %v1780_v16 = vmul.f32 %v1715_v7, %v3720_v3  ;;  %v1795_v37 = vadd.f32 %v1794_v25, %v1779_v22  ;;  %v1740_v5 = vpop.permute.xlu0 %1739  ;;  %v1781_v3 = vmul.f32 %v1720_v29, %v3677_v34  ;;  %v4220_v22 = vld [vmem:[#allocation23_spill] sm:$0xff] }
 0x2c7   : > { %vm3884_vm0 = vcmp.lt.f32.partialorder %v4209_v4, 0.11111111  ;;  %v4213_v51 = vand.u32 2147483647, %v3698_v27  ;;  %v4216_v53 = vand.u32 2147483647, %v3758_v50  ;;  %v1452_v60 = vsub.f32 %v1116_v23, %v3432_v30 }
 0x2c8   : > { %v1506_v44 = vadd.f32 %v1505_v31, %v1504_v0  ;;  %v1796_v14 = vadd.f32 %v1795_v37, %v1780_v16  ;;  %v1507_v40 = vsel %vm1489_vm10, %v1481_v45, 0.0  ;;  %v1166_v63 = vadd.f32 %v1149_v49, %v4219_v13 }
 0x2c9   : > { %vm3892_vm2 = vcmp.lt.f32.partialorder %v4213_v51, 0.11111111  ;;  %vm3898_vm11 = vcmp.lt.f32.partialorder %v4216_v53, 0.11111111  ;;  %v1469_v34 = vsub.f32 %v1165_v61, %v3693_v62  ;;  %v1725_v29 = vpop.permute.xlu1 %1724  ;;  %v1119_v25 = vadd.f32 %v1103_v47, %v4220_v22 }
 0x2ca   : > { %v1508_v27 = vadd.f32 %v1507_v40, %v1506_v44  ;;  %v1782_v59 = vmul.f32 %v1725_v29, %v3731_v11  ;;  %v1797_v20 = vadd.f32 %v1796_v14, %v1781_v3  ;;  %v1750_v50 = vpop.permute.xlu0 %1749  ;;  %v1167_v7 = vadd.f32 %v1151_v28, %v4221_v52 }
 0x2cb   : > { %v1453_v0 = vsub.f32 %v1117_v55, %v3801_v43  ;;  %v1484_v16 = vadd.f32 %v1468_v48, %v1452_v60  ;;  %v1454_v45 = vsub.f32 %v1118_v8, %v3821_v46  ;;  %v1783_v23 = vmul.f32 %v1730_v6, %v3716_v24  ;;  %v4223_v60 = vld [vmem:[#allocation41_spill] sm:$0xff] }
 0x2cc   : > { %v1510_v30 = vadd.f32 %v1509_v35, %v1508_v27  ;;  %v1798_v49 = vadd.f32 %v1797_v20, %v1782_v59  ;;  %v1625_v62 = vmul.f32 %v3827_v56, %v3761_v18  ;;  %v1470_v61 = vsub.f32 %v1166_v63, %v3743_v12 }
 0x2cd   : > { %v1485_v47 = vadd.f32 %v1469_v34, %v1453_v0  ;;  %v1511_v11 = vsel %vm1489_vm10, %v3502_v58, 0.0  ;;  %v1455_v37 = vsub.f32 %v1119_v25, %v3847_v21  ;;  %v1735_v31 = vpop.permute.xlu1 %1734  ;;  %v4222_v24 = vmov %v4209_v4 }
 0x2ce   : > { %v1512_v43 = vadd.f32 %v1511_v11, %v1510_v30  ;;  %v1784_v2 = vmul.f32 %v1735_v31, %v3793_v36  ;;  %v1799_v46 = vadd.f32 %v1798_v49, %v1783_v23  ;;  %v1760_v35 = vpop.permute.xlu0 %1759  ;;  %v2087_v6 = vadd.f32 -0.055555556, %v4222_v24 }
 0x2cf   : > { %v1471_v48 = vsub.f32 %v1167_v7, %v3783_v17  ;;  %v1513_v56 = vsel %vm1489_vm10, %v1484_v16, 0.0  ;;  %v1486_v12 = vadd.f32 %v1470_v61, %v1454_v45  ;;  %v1612_v28 = vmul.f32 4.5, %v3840_v26 }
 0x2d0   : > { %v1514_v41 = vadd.f32 %v1513_v56, %v1512_v43  ;;  %v1785_v58 = vmul.f32 %v1740_v5, %v3724_v10  ;;  %v1800_v21 = vadd.f32 %v1799_v46, %v1784_v2  ;;  %v1580_v55 = vand.u32 2147483647, %v3840_v26 }
 0x2d1   : > { %v1515_v36 = vsel %vm1489_vm10, %v1485_v47, 0.0  ;;  %v1487_v4 = vadd.f32 %v1471_v48, %v1455_v37  ;;  %v1745_v44 = vpop.permute.xlu1 %1744  ;;  %v1581_v18 = vand.u32 2147483647, %v3856_v54  ;;  %v1613_v38 = vmul.f32 4.5, %v3856_v54 }
 0x2d2   : > { %v1516_v17 = vadd.f32 %v1515_v36, %v1514_v41  ;;  %v1786_v8 = vmul.f32 %v1745_v44, %v3853_v32  ;;  %v1801_v3 = vadd.f32 %v1800_v21, %v1785_v58  ;;  %v1765_v14 = vpop.permute.xlu0 %1764  ;;  %v1657_v51 = vsel %vm3884_vm0, %v1625_v62, %v2087_v6 }
 0x2d3   : > { %v1517_v10 = vsel %vm1489_vm10, %v1486_v12, 0.0  ;;  %v1658_v5 = vsel %vm3892_vm2, %v3771_v57, %v3775_v9  ;;  %v1659_v53 = vsel %vm3898_vm11, %v3807_v1, %v3811_v19  ;;  %v1628_v40 = vmul.f32 %v1612_v28, %v3840_v26 }
 0x2d4   : > { %v1518_v32 = vadd.f32 %v1517_v10, %v1516_v17  ;;  %v1787_v13 = vmul.f32 %v1750_v50, %v4223_v60  ;;  %v1802_v63 = vadd.f32 %v1801_v3, %v1786_v8  ;;  %v2090_v39 = vadd.f32 -0.055555556, %v1580_v55 }
 0x2d5   : > { %v1519_v34 = vsel %vm1489_vm10, %v1487_v4, 0.0  ;;  %v1676_v29 = vsel %vm3595_vm14, %v1657_v51, 0.0  ;;  %v1755_v27 = vpop.permute.xlu1 %1754  ;;  %vm3946_vm12 = vcmp.lt.f32.partialorder %v1580_v55, 0.11111111  ;;  %v1629_v9 = vmul.f32 %v1613_v38, %v3856_v54 }
 0x2d6   : > { %v1788_v1 = vmul.f32 %v1755_v27, %v1676_v29  ;;  %v1803_v19 = vadd.f32 %v1802_v63, %v1787_v13  ;;  %v1770_v26 = vpop.permute.xlu0 %1769  ;;  %v1520_v33 = vadd.f32 %v1519_v34, %v1518_v32  ;;  %v2091_v42 = vadd.f32 -0.055555556, %v1581_v18 }
 0x2d7   : > { %v1677_v22 = vsel %vm3595_vm14, %v1658_v5, 0.0  ;;  %vm1597_vm13 = vcmp.lt.f32.partialorder %v1581_v18, 0.11111111  ;;  %v1660_v20 = vsel %vm3946_vm12, %v1628_v40, %v2090_v39  ;;  %v1678_v50 = vsel %vm3595_vm14, %v1659_v53, 0.0 }
 0x2d8   : > { %v1789_v25 = vmul.f32 %v1760_v35, %v1677_v22  ;;  %v1804_v59 = vadd.f32 %v1803_v19, %v1788_v1  ;;  %1521 = vadd.xlane.f32.xlu1 %v1520_v33  ;;  %v1790_v54 = vmul.f32 %v1765_v14, %v1678_v50  ;;  %v1661_v7 = vsel %vm1597_vm13, %v1629_v9, %v2091_v42 }
 0x2d9   : > { %v1679_v0 = vsel %vm3595_vm14, %v1660_v20, 0.0  ;;  %v1680_v23 = vsel %vm3595_vm14, %v1661_v7, 0.0 }
 0x2da   : > { %v1805_v52 = vadd.f32 %v1804_v59, %v1789_v25  ;;  %v1775_v16 = vpop.permute.xlu0 %1774  ;;  %v1791_v30 = vmul.f32 %v1770_v26, %v1679_v0 }
 0x2db   : > { %v1792_v62 = vmul.f32 %v1775_v16, %v1680_v23 }
 0x2dc   : > { %v1806_v45 = vadd.f32 %v1805_v52, %v1790_v54 }
 0x2de   : > { %v1807_v49 = vadd.f32 %v1806_v45, %v1791_v30 }
 0x2e0   : > { %v1808_v61 = vadd.f32 %v1807_v49, %v1792_v62 }
 0x2e2   : > { %1809 = vadd.xlane.f32.xlu0 %v1808_v61 }
 0x2e3   : > { %2415 = shalt.err (!%p2412_p7)
}
 0x2e4   : > { %s2416_s21 = scalar_lea.hbm %s3969_s27, 2048  ;;  %s2420_s18 = scalar_lea.hbm %s4101_s7, 4096 }
 0x2e5   : > { %p2417_p8 = scmp.ne.s32.totalorder %s3969_s27, %s2416_s21  ;;  %p2421_p11 = scmp.lt.u32.totalorder %s3969_s27, %s4101_s7 }
 0x2e6   : > { %p2422_p12 = scmp.lt.u32.totalorder %s2420_s18, %s2416_s21  ;;  %p2424_p0 = scmp.lt.u32.totalorder %s2416_s21, %s3969_s27 }
 0x2e7   : > { %p2418_p9 = pnand %p2417_p8, %p2633_p5 }
 0x2e8   : > { %p2423_p13 = por %p2422_p12, %p2421_p11 }
 0x2e9   : > { %p2419_p10 = pneg %p2418_p9 }
 0x2ea   : > { %p2425_p1 = por %p2424_p0, %p2423_p13 }
 0x2ec   : > { %p2426_p3 = pnand %p2425_p1, %p2419_p10 }
 0x2ee   : > { %2429 = shalt.err (!%p2426_p3)
}
 0x2ef   : > { %s2533_s11 = smov 128   ;;  %s2534_s22 = smov 8  }
 0x2f0   : > { %s4226_s30 = scalar_lea.sflag [#allocation3], %s2750_s26  ;;  %s4227_s20 = sshll.u32 %s2614_s17, 11 }
 0x2f1   : > { %2177 = dma.vmem_to_hbm [thread:$0]  (%p2633_p5), %s3971_s29, 2048, %s3969_s27, %s4226_s30, %s2533_s11, %s2533_s11, %s2534_s22  }
 0x2f2   : > { %s4005_s18 = scalar_lea.hbm %s4102_s8, %s4227_s20  ;;  %s1857_s12 = sshll.u32 %s3443_s28, 4  ;;  %s4008_s12 = int_to_ptr.vmem [resolvable:$true] %s1857_s12 }
 0x2f3   : > { %s1828_s0 = scalar_lea.sflag [#allocation6], %s2750_s26  ;;  %s2430_s1 = scalar_lea.vmem %s4008_s12, 2048 }
 0x2f4   : > { %p2431_p4 = scmp.ne.s32.totalorder %s4008_s12, %s2430_s1  ;;  %s2535_s2 = smov [#allocation5]  }
 0x2f5   : > { %s2434_s29 = sshll.u32 %s2535_s2, 4  ;;  %s2435_s29 = int_to_ptr.vmem [resolvable:$false] %s2434_s29 }
 0x2f6   : > { %p2432_p7 = pnand %p2431_p4, %p2633_p5  ;;  %s2436_s27 = scalar_lea.vmem %s2435_s29, 4096 }
 0x2f7   : > { %p2437_p9 = scmp.lt.s32.totalorder %s4008_s12, %s2435_s29  ;;  %p2438_p10 = scmp.lt.s32.totalorder %s2436_s27, %s2430_s1 }
 0x2f8   : > { %p2433_p8 = pneg %p2432_p7 }
 0x2f9   : > { %p2439_p11 = por %p2438_p10, %p2437_p9 }
 0x2fb   : > { %p2440_p12 = pnand %p2439_p11, %p2433_p8 }
 0x2fd   : > { %2443 = shalt.err (!%p2440_p12)
}
 0x2fe   : > { %s2444_s28 = scalar_lea.hbm %s4005_s18, 2048  ;;  %s2448_s2 = scalar_lea.hbm %s4102_s8, 4096 }
 0x2ff   : > { %p2445_p13 = scmp.ne.s32.totalorder %s4005_s18, %s2444_s28  ;;  %p2449_p3 = scmp.lt.u32.totalorder %s4005_s18, %s4102_s8 }
 0x300   : > { %p2450_p4 = scmp.lt.u32.totalorder %s2448_s2, %s2444_s28  ;;  %p2452_p8 = scmp.lt.u32.totalorder %s2444_s28, %s4005_s18 }
 0x301   : > { %p2446_p0 = pnand %p2445_p13, %p2633_p5 }
 0x302   : > { %p2451_p7 = por %p2450_p4, %p2449_p3 }
 0x303   : > { %p2447_p1 = pneg %p2446_p0 }
 0x304   : > { %p2453_p9 = por %p2452_p8, %p2451_p7 }
 0x306   : > { %p2454_p10 = pnand %p2453_p9, %p2447_p1 }
 0x308   : > { %2457 = shalt.err (!%p2454_p10)
}
 0x309   : > { %2178 = dma.vmem_to_hbm [thread:$0]  (%p2633_p5), %s4008_s12, 2048, %s4005_s18, %s1828_s0, %s2533_s11, %s2533_s11, %s2534_s22  }
 0x30a   : > { %s1488_s1 = sld [smem:[#allocation7]]  ;;  %s2458_s12 = scalar_lea.hbm %s4103_s9, 16 }
 0x30b   : > { %s1793_s11 = sld [smem:[#allocation8]]  ;;  %p2459_p5 = scmp.ne.s32.totalorder %s4103_s9, %s2458_s12 }
 0x30c   : > { %p2464_p13 = scmp.lt.u32.totalorder %s2458_s12, %s4103_s9 }
 0x30d   : > { %p2460_p11 = pnand %p2459_p5, %p219_p2 }
 0x30f   : > { %p2461_p12 = pneg %p2460_p11 }
 0x311   : > { %p2466_p0 = pnand %p2464_p13, %p2461_p12 }
 0x365   : > { %v1522_v15 = vpop.xlane.xlu1 %1521 }
 0x366   : > { %v1523_v47 = vrot.slane %v1522_v15, 4 }
 0x368   : > { %v1524_v11 = vadd.f32 %v1523_v47, %v1522_v15 }
 0x36a   : > { %v1525_v37 = vrot.slane %v1524_v11, 2 }
 0x36c   : > { %v1526_v31 = vadd.f32 %v1525_v37, %v1524_v11 }
 0x36e   : > { %v1527_v43 = vrot.slane %v1526_v31, 1 }
 0x36f   : > { %v1810_v2 = vpop.xlane.xlu0 %1809 }
 0x370   : > { %v1811_v46 = vrot.slane %v1810_v2, 4  ;;  %v1528_v35 = vadd.f32 %v1527_v43, %v1526_v31 }
 0x372   : > { %v1812_v24 = vadd.f32 %v1811_v46, %v1810_v2  ;;  %2170 = vpush %v1528_v35 }
 0x374   : > { %v1813_v6 = vrot.slane %v1812_v24, 2 }
 0x376   : > { %v1814_v48 = vadd.f32 %v1813_v6, %v1812_v24 }
 0x378   : > { %v1815_v56 = vrot.slane %v1814_v48, 1 }
 0x37a   : > { %v1816_v12 = vadd.f32 %v1815_v56, %v1814_v48 }
 0x37c   : > { %2172 = vpush %v1816_v12 }
 0x3a3   : > { %s2171_s23 = spop %2170 }
 0x3a4   : > { %s1530_s0 = smul.f32 0.00390625, %s2171_s23 }
 0x3a6   : > { %s1531_s26 = sadd.f32 %s1530_s0, %s1488_s1 }
 0x3a8   : > { %1533 = sst [smem:[#allocation7]] %s1531_s26 }
 0x3a9   : > { %2469 = shalt.err (!%p2466_p0)
}
 0x3aa   : > { %s2536_s20 = smov [#allocation7]   ;;  %s2470_s22 = scalar_lea.hbm %s4104_s10, 16 }
 0x3ab   : > { %2180 = dma.smem_to_hbm (%p219_p2), %s2536_s20, 16, %s4103_s9, [#allocation4]  }
 0x3ac   : > { %p2471_p1 = scmp.ne.s32.totalorder %s4104_s10, %s2470_s22  ;;  %p2476_p7 = scmp.lt.u32.totalorder %s2470_s22, %s4104_s10 }
 0x3ad   : > { %s2173_s25 = spop %2172 }
 0x3ae   : > { %s1818_s1 = smul.f32 0.00390625, %s2173_s25  ;;  %p2472_p3 = pnand %p2471_p1, %p219_p2 }
 0x3b0   : > { %s1819_s23 = sadd.f32 %s1818_s1, %s1793_s11  ;;  %p2473_p4 = pneg %p2472_p3 }
 0x3b2   : > { %1821 = sst [smem:[#allocation8]] %s1819_s23  ;;  %p2478_p8 = pnand %p2476_p7, %p2473_p4 }
 0x3b4   : > { %2481 = shalt.err (!%p2478_p8)
}
 0x3b5   : > { %s2537_s28 = smov [#allocation8]  }
 0x3b6   : > { %2182 = dma.smem_to_hbm (%p219_p2), %s2537_s28, 16, %s4104_s10, [#allocation9]  }
 0x3b7   : > { %2499 = dma.done.wait (%p219_p2), [#allocation4], 16  }
 0x3b8   : > { %2501 = vsyncadd (%p219_p2), [#allocation4], 4294967280 }
 0x3b9   : > { %2503 = dma.done.wait (%p219_p2), [#allocation9], 16  }
 0x3ba   : > { %2505 = vsyncadd (%p219_p2), [#allocation9], 4294967280 }
 0x3bb   : > { %1890 = sfence }
 0x3bc PF: > { %p2201_p9 = scmp.ge.s32.totalorder %s2528_s16, 2  ;;  %s1899_s20 = sand.u32 1, %s2516_s13  }
 0x3bd   : > { %s1900_s2 = scalar_lea.sflag [#allocation3], %s1899_s20 }
 0x3be   : > { %p2190_p10 = pnand %p2201_p9, %p2637_p6 }
 0x3c0   : > { %2507 = dma.done.wait (!%p2190_p10), %s1900_s2, 2048  }
 0x3c1   : > { %2509 = vsyncadd (!%p2190_p10), %s1900_s2, 4294965248  ;;  %s1909_s21 = scalar_lea.sflag [#allocation6], %s1899_s20 }
 0x3c2   : > { %2511 = dma.done.wait (!%p2190_p10), %s1909_s21, 2048  }
 0x3c3   : > { %2513 = vsyncadd (!%p2190_p10), %s1909_s21, 4294965248  ;;  %s4228_s17 = sld [smem:[#allocation14_spill]]  ;;  %p26_p2 = scmp.ge.s32.totalorder %s2618_s19, 4  }
 0x3c4   : > { %s4229_s13 = smov %s2520_s14  ;;  %s4230_s14 = smov %s2524_s15 }
 0x3c5   : > { %s4232_s16 = smov %s2618_s19  ;;  %28 = sbr.rel (!%p26_p2) target bundleno = 11 (0xb), region = 137 }
 0x3c9   : > { %s4231_s15 = smov %s4228_s17 }
 0x3cc   :  { %1914 = vsyncpa [#allocation3], 1 }
 0x3cd   :  { %1916 = vsyncpa [#allocation3 + $0x1], 1 }
 0x3ce   :  { %1917 = vsyncpa [#allocation6], 1 }
 0x3cf   :  { %1919 = vsyncpa [#allocation6 + $0x1], 1 }
 0x3d0   :  { %1920 = vsyncpa [#allocation4], 1 }
 0x3d1   :  { %1922 = vsyncpa [#allocation4 + $0x1], 1 }
 0x3d2   :  { %1923 = vsyncpa [#allocation9], 1 }

</bundles_post_ra>
